<compile_context>
chip_gen: v7x
topology: tpu7x:2x2x1
jax: 0.10.0
libtpu: 0.0.40
codegen_flags: <defaults>
</compile_context>

<pallas_src>
import functools
import math

import jax
import jax.numpy as jnp
from jax.experimental import pallas as pl
from jax.experimental.pallas import tpu as pltpu

LN_EPS = 1e-5


# ----------------------------- in-kernel helpers -----------------------------

def _layernorm(x, w, b):
    # PyTorch nn.LayerNorm semantics: biased variance over last dim, eps=1e-5.
    mu = jnp.mean(x, axis=-1, keepdims=True)
    var = jnp.mean(jnp.square(x - mu), axis=-1, keepdims=True)
    return (x - mu) * jax.lax.rsqrt(var + LN_EPS) * w + b


def _gelu_tanh(x):
    # tanh-GELU (EUP slot) instead of the erf polynomial (VALU-heavy);
    # max deviation vs GELU(approximate='none') ~1e-3.
    c = math.sqrt(2.0 / math.pi)
    return 0.5 * x * (1.0 + jnp.tanh(c * (x + 0.044715 * x * x * x)))


# ----------------------------- transformer-stack kernel -----------------------

def stack_kernel(x_ref, vecs_ref, bqkv_ref, wqkvo_ref, w1_ref, b1_ref, w2_ref,
                 lnf_ref, o_ref, x_sc, *, n_heads):
    """grid = (batch, layer); the activation block lives in x_sc across layers."""
    layer = pl.program_id(1)
    n_layers = pl.num_programs(1)
    S, D = x_sc.shape
    H = n_heads
    dh = D // H
    scale = 1.0 / math.sqrt(dh)

    # Load the embedding block into the resident activation scratch once per b.
    @pl.when(layer == 0)
    def _():
        x_sc[...] = x_ref[0]

    x = x_sc[...]                                            # (S, D) f32 residual

    vecs = vecs_ref[0]                                       # (6, D) f32
    ln1w, ln1b = vecs[0:1], vecs[1:2]
    bo = vecs[2:3]
    ln2w, ln2b = vecs[3:4], vecs[4:5]
    b2 = vecs[5:6]

    # ---------------- self-attention (pre-norm, residual) --------------------
    xn = _layernorm(x, ln1w, ln1b).astype(jnp.bfloat16)      # (S, D)
    wqkvo = wqkvo_ref[0]                                     # (4H, D, dh) bf16

    # One batched MXU einsum produces q, k, v for every head.  No in-kernel
    # activation reshapes/slices: the head split lives in the weight layout.
    qkv = jnp.einsum('nsd,nde->nse',
                     jnp.broadcast_to(xn, (3 * H, S, D)), wqkvo[:3 * H],
                     preferred_element_type=jnp.float32)     # (3H, S, dh)
    qkv = qkv + bqkv_ref[0]
    q = (qkv[:H] * scale).astype(jnp.bfloat16)               # (H, S, dh)
    k = qkv[H:2 * H].astype(jnp.bfloat16)
    v = qkv[2 * H:].astype(jnp.bfloat16)

    s = jnp.einsum('hqd,hkd->hqk', q, k,
                   preferred_element_type=jnp.float32)       # (H, S, S)
    s = s - jnp.max(s, axis=-1, keepdims=True)
    e = jnp.exp(s)
    p = e / jnp.sum(e, axis=-1, keepdims=True)               # exact softmax (f32)
    ctx = jnp.einsum('hqk,hkd->hqd', p.astype(jnp.bfloat16), v,
                     preferred_element_type=jnp.float32)     # (H, S, dh)

    # Per-head output projection; leading-axis sum == concat(heads) @ W_o.
    ctx_p = jnp.einsum('hsd,hed->hse', ctx.astype(jnp.bfloat16), wqkvo[3 * H:],
                       preferred_element_type=jnp.float32)   # (H, S, D)
    x = x + jnp.sum(ctx_p, axis=0) + bo

    # ---------------- feed-forward (pre-norm, residual) ----------------------
    xn2 = _layernorm(x, ln2w, ln2b).astype(jnp.bfloat16)
    h1 = jnp.dot(xn2, w1_ref[0], preferred_element_type=jnp.float32) + b1_ref[0]
    h1 = _gelu_tanh(h1)
    x = x + jnp.dot(h1.astype(jnp.bfloat16), w2_ref[0],
                    preferred_element_type=jnp.float32) + b2
    x_sc[...] = x

    # ---------------- final LayerNorm epilogue (last layer only) -------------
    @pl.when(layer == n_layers - 1)
    def _():
        o_ref[0] = _layernorm(x, lnf_ref[0:1], lnf_ref[1:2])


# ----------------------------- LM-head kernel ---------------------------------

def head_kernel(x_ref, w_ref, b_ref, o_ref):
    o_ref[...] = (jnp.dot(x_ref[...].astype(jnp.bfloat16), w_ref[...],
                          preferred_element_type=jnp.float32) + b_ref[...])


# ----------------------------- wrapper ----------------------------------------

def rawai_core_forward(input_ids, params):
    """Full RAWaiCore forward.  Embedding gathers are plain-JAX glue; all
    LayerNorm / attention / FFN / head compute runs in Pallas kernels."""
    B, S = input_ids.shape
    D = params["embed"].shape[1]
    H = params["n_heads"]
    V = params["vocab"]
    L = params["vecs"].shape[0]
    dh = D // H
    Vp = params["head_w"].shape[1]

    # stage != 'Gamma-90' -> Quant/DeQuant stubs are identity and omitted.
    # TODO(synk): the nn.Embedding gathers (dynamic index lookup) stay in
    # plain JAX; a Pallas scalar-prefetch DMA gather is not worth it here.
    x = (params["embed"][input_ids]
         + params["pos_embed"][:S][None]).astype(jnp.float32)        # (B, S, D)

    # VMEM budget (set explicitly so scaled shapes don't hit the 32 MiB scoped
    # default): x_sc + 2x double-buffered per-layer slabs + x/out blocks.
    per_layer = sum(int(params[n].nbytes) // L
                    for n in ("vecs", "bqkv", "wqkvo", "w1", "b1", "w2"))
    blk = S * D * 4
    est = 2 * (per_layer + 2 * blk) + int(params["lnf"].nbytes) + blk
    vmem_limit = int(min(max(2 * est, 32 << 20), 100 << 20))  # cap ~48 MiB on v7x

    xf = pl.pallas_call(
        functools.partial(stack_kernel, n_heads=H),
        out_shape=jax.ShapeDtypeStruct((B, S, D), jnp.float32),
        grid=(B, L),
        in_specs=[
            pl.BlockSpec((1, S, D), lambda b, l: (b, 0, 0)),             # x
            pl.BlockSpec((1, 6, D), lambda b, l: (l, 0, 0)),             # vecs
            pl.BlockSpec((1, 3 * H, 1, dh), lambda b, l: (l, 0, 0, 0)),  # bqkv
            pl.BlockSpec((1, 4 * H, D, dh), lambda b, l: (l, 0, 0, 0)),  # wqkvo
            pl.BlockSpec((1, D, 4 * D), lambda b, l: (l, 0, 0)),         # w1
            pl.BlockSpec((1, 1, 4 * D), lambda b, l: (l, 0, 0)),         # b1
            pl.BlockSpec((1, 4 * D, D), lambda b, l: (l, 0, 0)),         # w2
            pl.BlockSpec((2, D), lambda b, l: (0, 0)),                   # lnf
        ],
        out_specs=pl.BlockSpec((1, S, D), lambda b, l: (b, 0, 0)),
        scratch_shapes=[pltpu.VMEM((S, D), jnp.float32)],
        compiler_params=pltpu.CompilerParams(
            dimension_semantics=("parallel", "arbitrary"),
            vmem_limit_bytes=vmem_limit),
    )(x, params["vecs"], params["bqkv"], params["wqkvo"],
      params["w1"], params["b1"], params["w2"], params["lnf"])

    # LM head as a second call tiled over lane-dense vocab blocks, so head_w
    # never occupies VMEM while the transformer stack runs.  At scale use
    # 256/512-wide tiles (v6e/v7x MXU is 2x256^2).
    tn = 512 if Vp % 512 == 0 else (256 if Vp % 256 == 0 else 128)
    xf2 = xf.reshape(B * S, D)
    logits_p = pl.pallas_call(
        head_kernel,
        out_shape=jax.ShapeDtypeStruct((B * S, Vp), jnp.float32),
        grid=(Vp // tn,),
        in_specs=[
            pl.BlockSpec((B * S, D), lambda j: (0, 0)),
            pl.BlockSpec((D, tn), lambda j: (0, j)),
            pl.BlockSpec((1, tn), lambda j: (0, j)),
        ],
        out_specs=pl.BlockSpec((B * S, tn), lambda j: (0, j)),
        compiler_params=pltpu.CompilerParams(
            dimension_semantics=("parallel",)),
    )(xf2, params["head_w"], params["head_b"])

    return logits_p[:, :V].reshape(B, S, V)


# ----------------------------- parameter init --------------------------------

def init_params(key, vocab, seq_len, d_model, n_heads, n_layers):
    d, h = d_model, n_heads
    dh = d // h
    vp = max(128, ((vocab + 127) // 128) * 128)          # lane-dense padded vocab
    keys = jax.random.split(key, 3 + n_layers)

    def he_scaled(k, fan_in, fan_out, std=None, scale=1.1):
        # he_normal_scaled: kaiming_normal_(nonlinearity='linear') * 1.1, bias=0.
        if std is None:
            std = scale / math.sqrt(fan_in)
        return jax.random.normal(k, (fan_in, fan_out), jnp.float32) * std

    # TODO(synk): embed comes from torch.load(config.EMBED_INIT_PATH) in the
    # reference; replaced here by a synthetic pretrained table.
    embed = jax.random.normal(keys[0], (vocab, d), jnp.float32) * 0.02
    pos_embed = jax.random.normal(keys[1], (seq_len, d), jnp.float32)  # N(0,1)

    ones = jnp.ones((d,), jnp.float32)
    zeros = jnp.zeros((d,), jnp.float32)
    vecs_l, bqkv_l, wqkvo_l, w1_l, b1_l, w2_l = [], [], [], [], [], []
    for i in range(n_layers):
        lk = jax.random.split(keys[2 + i], 6)
        wq = he_scaled(lk[0], d, d, std=math.sqrt(1.0 / d))   # MHA in_proj (q)
        wk = he_scaled(lk[1], d, d, std=math.sqrt(1.0 / d))   # MHA in_proj (k)
        wv = he_scaled(lk[2], d, d, std=math.sqrt(1.0 / d))   # MHA in_proj (v)
        wo = he_scaled(lk[3], d, d)                           # MHA out_proj
        w1 = he_scaled(lk[4], d, 4 * d)                       # ffn[0]
        w2 = he_scaled(lk[5], 4 * d, d)                       # ffn[2]

        # Packed per-layer small-vector slab (all biases are zero-initialised):
        # [ln1_w, ln1_b, out_proj_b, ln2_w, ln2_b, ffn2_b]
        vecs_l.append(jnp.stack([ones, zeros, zeros, ones, zeros, zeros]))
        bqkv_l.append(jnp.zeros((3 * h, 1, dh), jnp.float32))

        # Head-major weight layout consumed by the kernel's batched einsums:
        #   rows [0, 3H): per-head column slices of wq/wk/wv  -> (D, dh)
        #   rows [3H, 4H): per-head row slices of wo, transposed -> (D, dh)
        wq_h = wq.reshape(d, h, dh).transpose(1, 0, 2)
        wk_h = wk.reshape(d, h, dh).transpose(1, 0, 2)
        wv_h = wv.reshape(d, h, dh).transpose(1, 0, 2)
        wo_h = wo.reshape(h, dh, d).transpose(0, 2, 1)
        wqkvo_l.append(jnp.concatenate([wq_h, wk_h, wv_h, wo_h], axis=0))

        w1_l.append(w1)
        b1_l.append(jnp.zeros((1, 4 * d), jnp.float32))
        w2_l.append(w2)

    hw = he_scaled(keys[2 + n_layers], d, vocab)              # LM head
    head_w = jnp.zeros((d, vp), jnp.float32).at[:, :vocab].set(hw)
    head_b = jnp.zeros((1, vp), jnp.float32)

    return dict(
        embed=embed, pos_embed=pos_embed,
        vecs=jnp.stack(vecs_l),
        bqkv=jnp.stack(bqkv_l),
        wqkvo=jnp.stack(wqkvo_l).astype(jnp.bfloat16),   # MXU-native weights
        w1=jnp.stack(w1_l).astype(jnp.bfloat16),
        b1=jnp.stack(b1_l),
        w2=jnp.stack(w2_l).astype(jnp.bfloat16),
        lnf=jnp.stack([ones, zeros]),
        head_w=head_w.astype(jnp.bfloat16),
        head_b=head_b,
        n_heads=n_heads, vocab=vocab)


# ----------------------------- main -------------------------------------------

if __name__ == "__main__":
    # Small config consistent with the module; stage != 'Gamma-90', so the
    # Quant/DeQuant stubs are not part of the forward pass.
    VOCAB, SEQ_LEN, D_MODEL, N_HEADS, N_LAYERS = 64, 8, 32, 4, 2
    BATCH = 2

    key = jax.random.PRNGKey(0)
    pkey, ikey = jax.random.split(key)
    params = init_params(pkey, VOCAB, SEQ_LEN, D_MODEL, N_HEADS, N_LAYERS)
    input_ids = jax.random.randint(ikey, (BATCH, SEQ_LEN), 0, VOCAB,
                                   dtype=jnp.int32)

    logits = rawai_core_forward(input_ids, params)
    logits = jax.block_until_ready(logits)

    assert logits.shape == (BATCH, SEQ_LEN, VOCAB), logits.shape
    assert bool(jnp.all(jnp.isfinite(logits)))
    print("KERNEL_OK")
</pallas_src>

<mosaic_0001>
module attributes {stable_mosaic.version = 11 : i64} {
  func.func @stack_kernel(%arg0: i32, %arg1: i32, %arg2: memref<1x8x32xf32, #tpu.memory_space<vmem>>, %arg3: memref<1x6x32xf32, #tpu.memory_space<vmem>>, %arg4: memref<1x12x1x8xf32, #tpu.memory_space<vmem>>, %arg5: memref<1x16x32x8xbf16, #tpu.memory_space<vmem>>, %arg6: memref<1x32x128xbf16, #tpu.memory_space<vmem>>, %arg7: memref<1x1x128xf32, #tpu.memory_space<vmem>>, %arg8: memref<1x128x32xbf16, #tpu.memory_space<vmem>>, %arg9: memref<2x32xf32, #tpu.memory_space<vmem>>, %arg10: memref<1x8x32xf32, #tpu.memory_space<vmem>>, %arg11: memref<8x32xf32, #tpu.memory_space<vmem>>) attributes {dimension_semantics = [#tpu.dimension_semantics<parallel>, #tpu.dimension_semantics<arbitrary>], iteration_bounds = array<i64: 2, 2>, scalar_prefetch = 0 : i64, scratch_operands = 1 : i64, tpu.core_type = #tpu.core_type<tc>, window_params = [{transform_indices = @transform_0, window_bounds = array<i64: 1, 8, 32>}, {transform_indices = @transform_1, window_bounds = array<i64: 1, 6, 32>}, {transform_indices = @transform_2, window_bounds = array<i64: 1, 12, 1, 8>}, {transform_indices = @transform_3, window_bounds = array<i64: 1, 16, 32, 8>}, {transform_indices = @transform_4, window_bounds = array<i64: 1, 32, 128>}, {transform_indices = @transform_5, window_bounds = array<i64: 1, 1, 128>}, {transform_indices = @transform_6, window_bounds = array<i64: 1, 128, 32>}, {pipeline_mode = #tpu.pipeline_mode<synchronous>, transform_indices = @transform_7, window_bounds = array<i64: 2, 32>}, {transform_indices = @transform_8, window_bounds = array<i64: 1, 8, 32>}]} {
    %c0_i32 = arith.constant 0 : i32
    %0 = arith.cmpi eq, %arg1, %c0_i32 : i32
    %1 = arith.extui %0 : i1 to i32
    %c0_i32_0 = arith.constant 0 : i32
    %2 = arith.cmpi ne, %1, %c0_i32_0 : i32
    scf.if %2 {
      %c0_48 = arith.constant 0 : index
      %c0_49 = arith.constant 0 : index
      %c0_50 = arith.constant 0 : index
      %126 = vector.load %arg2[%c0_48, %c0_49, %c0_50] : memref<1x8x32xf32, #tpu.memory_space<vmem>>, vector<1x8x32xf32>
      %127 = vector.shape_cast %126 : vector<1x8x32xf32> to vector<8x32xf32>
      %c0_51 = arith.constant 0 : index
      %c0_52 = arith.constant 0 : index
      %128 = vector.load %arg11[%c0_51, %c0_52] : memref<8x32xf32, #tpu.memory_space<vmem>>, vector<8x32xf32>
      tpu.vector_store %arg11[%c0_51, %c0_52], %127 {strides = array<i32>} : memref<8x32xf32, #tpu.memory_space<vmem>>, vector<8x32xf32>,
    } else {
    }
    %c0 = arith.constant 0 : index
    %c0_1 = arith.constant 0 : index
    %3 = vector.load %arg11[%c0, %c0_1] : memref<8x32xf32, #tpu.memory_space<vmem>>, vector<8x32xf32>
    %c0_2 = arith.constant 0 : index
    %c0_3 = arith.constant 0 : index
    %c0_4 = arith.constant 0 : index
    %4 = vector.load %arg3[%c0_2, %c0_3, %c0_4] : memref<1x6x32xf32, #tpu.memory_space<vmem>>, vector<1x6x32xf32>
    %5 = vector.shape_cast %4 : vector<1x6x32xf32> to vector<6x32xf32>
    %6 = vector.extract_strided_slice %5 {offsets = [0, 0], sizes = [1, 32], strides = [1, 1]} : vector<6x32xf32> to vector<1x32xf32>
    %7 = vector.extract_strided_slice %5 {offsets = [1, 0], sizes = [1, 32], strides = [1, 1]} : vector<6x32xf32> to vector<1x32xf32>
    %8 = vector.extract_strided_slice %5 {offsets = [2, 0], sizes = [1, 32], strides = [1, 1]} : vector<6x32xf32> to vector<1x32xf32>
    %9 = vector.extract_strided_slice %5 {offsets = [3, 0], sizes = [1, 32], strides = [1, 1]} : vector<6x32xf32> to vector<1x32xf32>
    %10 = vector.extract_strided_slice %5 {offsets = [4, 0], sizes = [1, 32], strides = [1, 1]} : vector<6x32xf32> to vector<1x32xf32>
    %11 = vector.extract_strided_slice %5 {offsets = [5, 0], sizes = [1, 32], strides = [1, 1]} : vector<6x32xf32> to vector<1x32xf32>
    %cst = arith.constant dense<0.000000e+00> : vector<8xf32>
    %12 = vector.multi_reduction <add>, %3, %cst [1] : vector<8x32xf32> to vector<8xf32>
    %13 = vector.shape_cast %12 : vector<8xf32> to vector<8x1xf32>
    %cst_5 = arith.constant 3.200000e+01 : f32
    %14 = vector.broadcast %cst_5 : f32 to vector<8x1xf32>
    %15 = arith.divf %13, %14 : vector<8x1xf32>
    %16 = vector.broadcast %15 : vector<8x1xf32> to vector<8x32xf32>
    %17 = arith.subf %3, %16 : vector<8x32xf32>
    %18 = arith.mulf %17, %17 : vector<8x32xf32>
    %cst_6 = arith.constant dense<0.000000e+00> : vector<8xf32>
    %19 = vector.multi_reduction <add>, %18, %cst_6 [1] : vector<8x32xf32> to vector<8xf32>
    %20 = vector.shape_cast %19 : vector<8xf32> to vector<8x1xf32>
    %cst_7 = arith.constant 3.200000e+01 : f32
    %21 = vector.broadcast %cst_7 : f32 to vector<8x1xf32>
    %22 = arith.divf %20, %21 : vector<8x1xf32>
    %23 = vector.broadcast %15 : vector<8x1xf32> to vector<8x32xf32>
    %24 = arith.subf %3, %23 : vector<8x32xf32>
    %cst_8 = arith.constant 9.99999974E-6 : f32
    %25 = vector.broadcast %cst_8 : f32 to vector<8x1xf32>
    %26 = arith.addf %22, %25 : vector<8x1xf32>
    %27 = math.rsqrt %26 : vector<8x1xf32>
    %28 = vector.broadcast %27 : vector<8x1xf32> to vector<8x32xf32>
    %29 = arith.mulf %24, %28 : vector<8x32xf32>
    %30 = vector.broadcast %6 : vector<1x32xf32> to vector<8x32xf32>
    %31 = arith.mulf %29, %30 : vector<8x32xf32>
    %32 = vector.broadcast %7 : vector<1x32xf32> to vector<8x32xf32>
    %33 = arith.addf %31, %32 : vector<8x32xf32>
    %34 = arith.truncf %33 : vector<8x32xf32> to vector<8x32xbf16>
    %c0_9 = arith.constant 0 : index
    %c0_10 = arith.constant 0 : index
    %c0_11 = arith.constant 0 : index
    %c0_12 = arith.constant 0 : index
    %35 = vector.load %arg5[%c0_9, %c0_10, %c0_11, %c0_12] : memref<1x16x32x8xbf16, #tpu.memory_space<vmem>>, vector<1x16x32x8xbf16>
    %36 = vector.shape_cast %35 : vector<1x16x32x8xbf16> to vector<16x32x8xbf16>
    %37 = vector.shape_cast %34 : vector<8x32xbf16> to vector<1x8x32xbf16>
    %38 = vector.broadcast %37 : vector<1x8x32xbf16> to vector<12x8x32xbf16>
    %39 = vector.extract_strided_slice %36 {offsets = [0, 0, 0], sizes = [12, 32, 8], strides = [1, 1, 1]} : vector<16x32x8xbf16> to vector<12x32x8xbf16>
    "tpu.trace_start"() <{level = 10 : i32, message = "nsd,nde->nse"}> : () -> ()
    %cst_13 = arith.constant dense<0.000000e+00> : vector<12x8x8xf32>
    %40 = tpu.matmul %38, %39, %cst_13 {dimension_numbers = #tpu.dot_dimension_numbers<[2], [1], [1], [2], [0, 0, 0, 1, 1, 2], [0], [0]>} : vector<12x8x32xbf16>, vector<12x32x8xbf16>, vector<12x8x8xf32> -> vector<12x8x8xf32>
    "tpu.trace_stop"() : () -> ()
    %c0_14 = arith.constant 0 : index
    %c0_15 = arith.constant 0 : index
    %c0_16 = arith.constant 0 : index
    %c0_17 = arith.constant 0 : index
    %41 = vector.load %arg4[%c0_14, %c0_15, %c0_16, %c0_17] : memref<1x12x1x8xf32, #tpu.memory_space<vmem>>, vector<1x12x1x8xf32>
    %42 = vector.shape_cast %41 : vector<1x12x1x8xf32> to vector<12x1x8xf32>
    %43 = vector.broadcast %42 : vector<12x1x8xf32> to vector<12x8x8xf32>
    %44 = arith.addf %40, %43 : vector<12x8x8xf32>
    %45 = vector.extract_strided_slice %44 {offsets = [0, 0, 0], sizes = [4, 8, 8], strides = [1, 1, 1]} : vector<12x8x8xf32> to vector<4x8x8xf32>
    %cst_18 = arith.constant 0.353553385 : f32
    %46 = vector.broadcast %cst_18 : f32 to vector<4x8x8xf32>
    %47 = arith.mulf %45, %46 : vector<4x8x8xf32>
    %48 = arith.truncf %47 : vector<4x8x8xf32> to vector<4x8x8xbf16>
    %49 = vector.extract_strided_slice %44 {offsets = [4, 0, 0], sizes = [4, 8, 8], strides = [1, 1, 1]} : vector<12x8x8xf32> to vector<4x8x8xf32>
    %50 = arith.truncf %49 : vector<4x8x8xf32> to vector<4x8x8xbf16>
    %51 = vector.extract_strided_slice %44 {offsets = [8, 0, 0], sizes = [4, 8, 8], strides = [1, 1, 1]} : vector<12x8x8xf32> to vector<4x8x8xf32>
    %52 = arith.truncf %51 : vector<4x8x8xf32> to vector<4x8x8xbf16>
    "tpu.trace_start"() <{level = 10 : i32, message = "hqd,hkd->hqk"}> : () -> ()
    %cst_19 = arith.constant dense<0.000000e+00> : vector<4x8x8xf32>
    %53 = tpu.matmul %48, %50, %cst_19 {dimension_numbers = #tpu.dot_dimension_numbers<[2], [2], [1], [1], [0, 0, 0, 1, 1, 1], [0], [0]>} : vector<4x8x8xbf16>, vector<4x8x8xbf16>, vector<4x8x8xf32> -> vector<4x8x8xf32>
    "tpu.trace_stop"() : () -> ()
    %cst_20 = arith.constant dense<0xFF800000> : vector<4x8xf32>
    %54 = vector.multi_reduction <maximumf>, %53, %cst_20 [2] : vector<4x8x8xf32> to vector<4x8xf32>
    %55 = vector.shape_cast %54 : vector<4x8xf32> to vector<4x8x1xf32>
    %56 = vector.broadcast %55 : vector<4x8x1xf32> to vector<4x8x8xf32>
    %57 = arith.subf %53, %56 : vector<4x8x8xf32>
    %58 = math.exp %57 : vector<4x8x8xf32>
    %cst_21 = arith.constant dense<0.000000e+00> : vector<4x8xf32>
    %59 = vector.multi_reduction <add>, %58, %cst_21 [2] : vector<4x8x8xf32> to vector<4x8xf32>
    %60 = vector.shape_cast %59 : vector<4x8xf32> to vector<4x8x1xf32>
    %61 = vector.broadcast %60 : vector<4x8x1xf32> to vector<4x8x8xf32>
    %62 = arith.divf %58, %61 : vector<4x8x8xf32>
    %63 = arith.truncf %62 : vector<4x8x8xf32> to vector<4x8x8xbf16>
    "tpu.trace_start"() <{level = 10 : i32, message = "hqk,hkd->hqd"}> : () -> ()
    %cst_22 = arith.constant dense<0.000000e+00> : vector<4x8x8xf32>
    %64 = tpu.matmul %63, %52, %cst_22 {dimension_numbers = #tpu.dot_dimension_numbers<[2], [1], [1], [2], [0, 0, 0, 1, 1, 2], [0], [0]>} : vector<4x8x8xbf16>, vector<4x8x8xbf16>, vector<4x8x8xf32> -> vector<4x8x8xf32>
    "tpu.trace_stop"() : () -> ()
    %65 = arith.truncf %64 : vector<4x8x8xf32> to vector<4x8x8xbf16>
    %66 = vector.extract_strided_slice %36 {offsets = [12, 0, 0], sizes = [4, 32, 8], strides = [1, 1, 1]} : vector<16x32x8xbf16> to vector<4x32x8xbf16>
    "tpu.trace_start"() <{level = 10 : i32, message = "hsd,hed->hse"}> : () -> ()
    %cst_23 = arith.constant dense<0.000000e+00> : vector<4x8x32xf32>
    %67 = tpu.matmul %65, %66, %cst_23 {dimension_numbers = #tpu.dot_dimension_numbers<[2], [2], [1], [1], [0, 0, 0, 1, 1, 1], [0], [0]>} : vector<4x8x8xbf16>, vector<4x32x8xbf16>, vector<4x8x32xf32> -> vector<4x8x32xf32>
    "tpu.trace_stop"() : () -> ()
    %cst_24 = arith.constant dense<0.000000e+00> : vector<8x32xf32>
    %68 = vector.multi_reduction <add>, %67, %cst_24 [0] : vector<4x8x32xf32> to vector<8x32xf32>
    %69 = arith.addf %3, %68 : vector<8x32xf32>
    %70 = vector.broadcast %8 : vector<1x32xf32> to vector<8x32xf32>
    %71 = arith.addf %69, %70 : vector<8x32xf32>
    %cst_25 = arith.constant dense<0.000000e+00> : vector<8xf32>
    %72 = vector.multi_reduction <add>, %71, %cst_25 [1] : vector<8x32xf32> to vector<8xf32>
    %73 = vector.shape_cast %72 : vector<8xf32> to vector<8x1xf32>
    %cst_26 = arith.constant 3.200000e+01 : f32
    %74 = vector.broadcast %cst_26 : f32 to vector<8x1xf32>
    %75 = arith.divf %73, %74 : vector<8x1xf32>
    %76 = vector.broadcast %75 : vector<8x1xf32> to vector<8x32xf32>
    %77 = arith.subf %71, %76 : vector<8x32xf32>
    %78 = arith.mulf %77, %77 : vector<8x32xf32>
    %cst_27 = arith.constant dense<0.000000e+00> : vector<8xf32>
    %79 = vector.multi_reduction <add>, %78, %cst_27 [1] : vector<8x32xf32> to vector<8xf32>
    %80 = vector.shape_cast %79 : vector<8xf32> to vector<8x1xf32>
    %cst_28 = arith.constant 3.200000e+01 : f32
    %81 = vector.broadcast %cst_28 : f32 to vector<8x1xf32>
    %82 = arith.divf %80, %81 : vector<8x1xf32>
    %83 = vector.broadcast %75 : vector<8x1xf32> to vector<8x32xf32>
    %84 = arith.subf %71, %83 : vector<8x32xf32>
    %cst_29 = arith.constant 9.99999974E-6 : f32
    %85 = vector.broadcast %cst_29 : f32 to vector<8x1xf32>
    %86 = arith.addf %82, %85 : vector<8x1xf32>
    %87 = math.rsqrt %86 : vector<8x1xf32>
    %88 = vector.broadcast %87 : vector<8x1xf32> to vector<8x32xf32>
    %89 = arith.mulf %84, %88 : vector<8x32xf32>
    %90 = vector.broadcast %9 : vector<1x32xf32> to vector<8x32xf32>
    %91 = arith.mulf %89, %90 : vector<8x32xf32>
    %92 = vector.broadcast %10 : vector<1x32xf32> to vector<8x32xf32>
    %93 = arith.addf %91, %92 : vector<8x32xf32>
    %94 = arith.truncf %93 : vector<8x32xf32> to vector<8x32xbf16>
    %c0_30 = arith.constant 0 : index
    %c0_31 = arith.constant 0 : index
    %c0_32 = arith.constant 0 : index
    %95 = vector.load %arg6[%c0_30, %c0_31, %c0_32] : memref<1x32x128xbf16, #tpu.memory_space<vmem>>, vector<1x32x128xbf16>
    %96 = vector.shape_cast %95 : vector<1x32x128xbf16> to vector<32x128xbf16>
    %cst_33 = arith.constant dense<0.000000e+00> : vector<8x128xf32>
    %97 = tpu.matmul %94, %96, %cst_33 {dimension_numbers = #tpu.dot_dimension_numbers<[1], [0], [0], [1], [0, 0, 1, 1], [], []>} : vector<8x32xbf16>, vector<32x128xbf16>, vector<8x128xf32> -> vector<8x128xf32>
    %c0_34 = arith.constant 0 : index
    %c0_35 = arith.constant 0 : index
    %c0_36 = arith.constant 0 : index
    %98 = vector.load %arg7[%c0_34, %c0_35, %c0_36] : memref<1x1x128xf32, #tpu.memory_space<vmem>>, vector<1x1x128xf32>
    %99 = vector.shape_cast %98 : vector<1x1x128xf32> to vector<1x128xf32>
    %100 = vector.broadcast %99 : vector<1x128xf32> to vector<8x128xf32>
    %101 = arith.addf %97, %100 : vector<8x128xf32>
    %cst_37 = arith.constant 5.000000e-01 : f32
    %102 = vector.broadcast %cst_37 : f32 to vector<8x128xf32>
    %103 = arith.mulf %102, %101 : vector<8x128xf32>
    %cst_38 = arith.constant 4.471500e-02 : f32
    %104 = vector.broadcast %cst_38 : f32 to vector<8x128xf32>
    %105 = arith.mulf %104, %101 : vector<8x128xf32>
    %106 = arith.mulf %105, %101 : vector<8x128xf32>
    %107 = arith.mulf %106, %101 : vector<8x128xf32>
    %108 = arith.addf %101, %107 : vector<8x128xf32>
    %cst_39 = arith.constant 0.797884583 : f32
    %109 = vector.broadcast %cst_39 : f32 to vector<8x128xf32>
    %110 = arith.mulf %109, %108 : vector<8x128xf32>
    %111 = math.tanh %110 : vector<8x128xf32>
    %cst_40 = arith.constant 1.000000e+00 : f32
    %112 = vector.broadcast %cst_40 : f32 to vector<8x128xf32>
    %113 = arith.addf %112, %111 : vector<8x128xf32>
    %114 = arith.mulf %103, %113 : vector<8x128xf32>
    %115 = arith.truncf %114 : vector<8x128xf32> to vector<8x128xbf16>
    %c0_41 = arith.constant 0 : index
    %c0_42 = arith.constant 0 : index
    %c0_43 = arith.constant 0 : index
    %116 = vector.load %arg8[%c0_41, %c0_42, %c0_43] : memref<1x128x32xbf16, #tpu.memory_space<vmem>>, vector<1x128x32xbf16>
    %117 = vector.shape_cast %116 : vector<1x128x32xbf16> to vector<128x32xbf16>
    %cst_44 = arith.constant dense<0.000000e+00> : vector<8x32xf32>
    %118 = tpu.matmul %115, %117, %cst_44 {dimension_numbers = #tpu.dot_dimension_numbers<[1], [0], [0], [1], [0, 0, 1, 1], [], []>} : vector<8x128xbf16>, vector<128x32xbf16>, vector<8x32xf32> -> vector<8x32xf32>
    %119 = arith.addf %71, %118 : vector<8x32xf32>
    %120 = vector.broadcast %11 : vector<1x32xf32> to vector<8x32xf32>
    %121 = arith.addf %119, %120 : vector<8x32xf32>
    %c0_45 = arith.constant 0 : index
    %c0_46 = arith.constant 0 : index
    %122 = vector.load %arg11[%c0_45, %c0_46] : memref<8x32xf32, #tpu.memory_space<vmem>>, vector<8x32xf32>
    tpu.vector_store %arg11[%c0_45, %c0_46], %121 {strides = array<i32>} : memref<8x32xf32, #tpu.memory_space<vmem>>, vector<8x32xf32>,
    %c1_i32 = arith.constant 1 : i32
    %123 = arith.cmpi eq, %arg1, %c1_i32 : i32
    %124 = arith.extui %123 : i1 to i32
    %c0_i32_47 = arith.constant 0 : i32
    %125 = arith.cmpi ne, %124, %c0_i32_47 : i32
    scf.if %125 {
      %c0_48 = arith.constant 0 : index
      %c0_49 = arith.constant 0 : index
      %126 = vector.load %arg9[%c0_48, %c0_49] : memref<2x32xf32, #tpu.memory_space<vmem>>, vector<1x32xf32>
      %c1 = arith.constant 1 : index
      %c0_50 = arith.constant 0 : index
      %127 = vector.load %arg9[%c1, %c0_50] : memref<2x32xf32, #tpu.memory_space<vmem>>, vector<1x32xf32>
      %cst_51 = arith.constant dense<0.000000e+00> : vector<8xf32>
      %128 = vector.multi_reduction <add>, %121, %cst_51 [1] : vector<8x32xf32> to vector<8xf32>
      %129 = vector.shape_cast %128 : vector<8xf32> to vector<8x1xf32>
      %cst_52 = arith.constant 3.200000e+01 : f32
      %130 = vector.broadcast %cst_52 : f32 to vector<8x1xf32>
      %131 = arith.divf %129, %130 : vector<8x1xf32>
      %132 = vector.broadcast %131 : vector<8x1xf32> to vector<8x32xf32>
      %133 = arith.subf %121, %132 : vector<8x32xf32>
      %134 = arith.mulf %133, %133 : vector<8x32xf32>
      %cst_53 = arith.constant dense<0.000000e+00> : vector<8xf32>
      %135 = vector.multi_reduction <add>, %134, %cst_53 [1] : vector<8x32xf32> to vector<8xf32>
      %136 = vector.shape_cast %135 : vector<8xf32> to vector<8x1xf32>
      %cst_54 = arith.constant 3.200000e+01 : f32
      %137 = vector.broadcast %cst_54 : f32 to vector<8x1xf32>
      %138 = arith.divf %136, %137 : vector<8x1xf32>
      %139 = vector.broadcast %131 : vector<8x1xf32> to vector<8x32xf32>
      %140 = arith.subf %121, %139 : vector<8x32xf32>
      %cst_55 = arith.constant 9.99999974E-6 : f32
      %141 = vector.broadcast %cst_55 : f32 to vector<8x1xf32>
      %142 = arith.addf %138, %141 : vector<8x1xf32>
      %143 = math.rsqrt %142 : vector<8x1xf32>
      %144 = vector.broadcast %143 : vector<8x1xf32> to vector<8x32xf32>
      %145 = arith.mulf %140, %144 : vector<8x32xf32>
      %146 = vector.broadcast %126 : vector<1x32xf32> to vector<8x32xf32>
      %147 = arith.mulf %145, %146 : vector<8x32xf32>
      %148 = vector.broadcast %127 : vector<1x32xf32> to vector<8x32xf32>
      %149 = arith.addf %147, %148 : vector<8x32xf32>
      %c0_56 = arith.constant 0 : index
      %c0_57 = arith.constant 0 : index
      %c0_58 = arith.constant 0 : index
      %150 = vector.load %arg10[%c0_56, %c0_57, %c0_58] : memref<1x8x32xf32, #tpu.memory_space<vmem>>, vector<1x8x32xf32>
      %151 = vector.shape_cast %150 : vector<1x8x32xf32> to vector<8x32xf32>
      %152 = vector.shape_cast %149 : vector<8x32xf32> to vector<1x8x32xf32>
      tpu.vector_store %arg10[%c0_56, %c0_57, %c0_58], %152 {strides = array<i32>} : memref<1x8x32xf32, #tpu.memory_space<vmem>>, vector<1x8x32xf32>,
    } else {
    }
    return
  }
  func.func @transform_0(%arg0: i32, %arg1: i32) -> (i32, i32, i32) {
    %c0_i32 = arith.constant 0 : i32
    %c0_i32_0 = arith.constant 0 : i32
    %c0_i32_1 = arith.constant 0 : i32
    return %arg0, %c0_i32, %c0_i32_0 : i32, i32, i32
  }
  func.func @transform_1(%arg0: i32, %arg1: i32) -> (i32, i32, i32) {
    %c0_i32 = arith.constant 0 : i32
    %c0_i32_0 = arith.constant 0 : i32
    %c0_i32_1 = arith.constant 0 : i32
    return %arg1, %c0_i32, %c0_i32_0 : i32, i32, i32
  }
  func.func @transform_2(%arg0: i32, %arg1: i32) -> (i32, i32, i32, i32) {
    %c0_i32 = arith.constant 0 : i32
    %c0_i32_0 = arith.constant 0 : i32
    %c0_i32_1 = arith.constant 0 : i32
    %c0_i32_2 = arith.constant 0 : i32
    return %arg1, %c0_i32, %c0_i32_0, %c0_i32_1 : i32, i32, i32, i32
  }
  func.func @transform_3(%arg0: i32, %arg1: i32) -> (i32, i32, i32, i32) {
    %c0_i32 = arith.constant 0 : i32
    %c0_i32_0 = arith.constant 0 : i32
    %c0_i32_1 = arith.constant 0 : i32
    %c0_i32_2 = arith.constant 0 : i32
    return %arg1, %c0_i32, %c0_i32_0, %c0_i32_1 : i32, i32, i32, i32
  }
  func.func @transform_4(%arg0: i32, %arg1: i32) -> (i32, i32, i32) {
    %c0_i32 = arith.constant 0 : i32
    %c0_i32_0 = arith.constant 0 : i32
    %c0_i32_1 = arith.constant 0 : i32
    return %arg1, %c0_i32, %c0_i32_0 : i32, i32, i32
  }
  func.func @transform_5(%arg0: i32, %arg1: i32) -> (i32, i32, i32) {
    %c0_i32 = arith.constant 0 : i32
    %c0_i32_0 = arith.constant 0 : i32
    %c0_i32_1 = arith.constant 0 : i32
    return %arg1, %c0_i32, %c0_i32_0 : i32, i32, i32
  }
  func.func @transform_6(%arg0: i32, %arg1: i32) -> (i32, i32, i32) {
    %c0_i32 = arith.constant 0 : i32
    %c0_i32_0 = arith.constant 0 : i32
    %c0_i32_1 = arith.constant 0 : i32
    return %arg1, %c0_i32, %c0_i32_0 : i32, i32, i32
  }
  func.func @transform_7(%arg0: i32, %arg1: i32) -> (i32, i32) {
    %c0_i32 = arith.constant 0 : i32
    %c0_i32_0 = arith.constant 0 : i32
    %c0_i32_1 = arith.constant 0 : i32
    return %c0_i32, %c0_i32_0 : i32, i32
  }
  func.func @transform_8(%arg0: i32, %arg1: i32) -> (i32, i32, i32) {
    %c0_i32 = arith.constant 0 : i32
    %c0_i32_0 = arith.constant 0 : i32
    %c0_i32_1 = arith.constant 0 : i32
    return %arg0, %c0_i32, %c0_i32_0 : i32, i32, i32
  }
}

</mosaic_0001>

<bundles_post_ra>
// kernel: tpu_custom_call.1
= control target key start
LH: loop header
LB: loop body
LE: loop exit
PB: predicated region body
PF: predicated region fallthrough
CT: control target
= control target key end

     0   :  { %s3434_s0 = inlined_call_operand.vmem [shape: f32[2,8,32], index: 0, kind: input, shape index: {}]   ;;  %s3435_s1 = inlined_call_operand.vmem [shape: f32[2,6,32], index: 1, kind: input, shape index: {}]   ;;  %s3436_s2 = inlined_call_operand.vmem [shape: f32[2,12,1,8], index: 2, kind: input, shape index: {}]   ;;  %s3437_s3 = inlined_call_operand.vmem [shape: bf16[2,16,32,8], index: 3, kind: input, shape index: {}]   ;;  %s3438_s4 = inlined_call_operand.vmem [shape: bf16[2,32,128], index: 4, kind: input, shape index: {}]   ;;  %s3439_s5 = inlined_call_operand.vmem [shape: f32[2,1,128], index: 5, kind: input, shape index: {}]   ;;  %s3440_s6 = inlined_call_operand.vmem [shape: bf16[2,128,32], index: 6, kind: input, shape index: {}]   ;;  %s3441_s7 = inlined_call_operand.vmem [shape: f32[2,32], index: 7, kind: input, shape index: {}]   ;;  %s3442_s8 = inlined_call_operand.hbm [shape: f32[2,8,32], index: 8, kind: output, shape index: {}]  }
   0x1   :  { %3455 = sst [smem:[#allocation16_spill]] %s3434_s0 }
   0x2   :  { %3456 = sst [smem:[#allocation17_spill]] %s3435_s1 }
   0x3   :  { %3457 = sst [smem:[#allocation18_spill]] %s3442_s8 }
   0x4   :  { %13 = vsyncpa [#allocation4], 0 }
   0x5   :  { %15 = vsyncpa [#allocation4 + $0x1], 0  ;;  %s2982_s27 = smov 0   ;;  %s2984_s28 = smov 0  }
   0x6   :  { %s2986_s29 = smov 0   ;;  %s2988_s30 = smov 0  }
   0x7   :  { %s2990_s9 = smov 0   ;;  %s2992_s10 = smov 0  }
   0x8   :  { %s2994_s11 = smov 0   ;;  %s2996_s12 = smov 0  }
   0x9 LB: > { %3458 = sst [smem:[#allocation6_spill]] %s2904_s27  ;;  %s2313_s13 = sadd.s32 4294967295, %s2932_s12   ;;  %s2932_s12 = sphi %s2996_s12, %s21_s12   ;;  %s2928_s11 = sphi %s2994_s11, %s3483_s11   ;;  %s2924_s10 = sphi %s2992_s10, %s3482_s10   ;;  %s2920_s9 = sphi %s2990_s9, %s3481_s9   ;;  %s2916_s30 = sphi %s2988_s30, %s3480_s30   ;;  %s2912_s29 = sphi %s2986_s29, %s3479_s29   ;;  %s2908_s28 = sphi %s2984_s28, %s3485_s28   ;;  %s2904_s27 = sphi %s2982_s27, %s3484_s27  }
   0xa   : > { %3459 = sst [smem:[#allocation7_spill]] %s2912_s29  ;;  %s2314_s14 = sadd.s32 4294967294, %s2932_s12  }
   0xb   : > { %3460 = sst [smem:[#allocation8_spill]] %s2924_s10  ;;  %s30_s15 = sadd.s32 1, %s2924_s10 }
   0xc   : > { %3461 = sst [smem:[#allocation9_spill]] %s2928_s11  ;;  %p31_p0 = scmp.ge.s32.totalorder %s30_s15, 2 }
   0xd   : > { %3462 = sst [smem:[#allocation10_spill]] %s2932_s12  ;;  %s33_s16 = sadd.s32 1, %s2928_s11 }
   0xe   : > { %p253_p1 = scmp.ne.s32.totalorder %s2912_s29, %s2908_s28  ;;  %p254_p2 = scmp.eq.s32.totalorder %s2313_s13, 3 }
   0xf   : > { %s3487_s15 = smov (%p31_p0, %s30_s15), 0  ;;  %s3489_s16 = smov (!%p31_p0, %s33_s16), %s2928_s11 }
  0x10   : > { %3463 = sst [smem:[#allocation11_spill]] %s3487_s15  ;;  %p3031_p3 = por %p254_p2, %p253_p1 }
  0x11   : > { %p259_p4 = scmp.ne.s32.totalorder %s2908_s28, %s2904_s27  ;;  %p35_p5 = scmp.ge.s32.totalorder %s3489_s16, 2 }
  0x12   : > { %s3464_s17 = scalar_select %p3031_p3, 1, 0 }
  0x13   : > { %p260_p6 = scmp.eq.s32.totalorder %s2314_s14, 3  ;;  %p2317_p7 = scmp.ge.s32.totalorder %s2932_s12, 1 }
  0x14   : > { %3465 = sst [smem:[#allocation12_spill]] %s3464_s17  ;;  %p332_p8 = scmp.lt.s32.totalorder %s2932_s12, 5 }
  0x15   : > { %s3491_s16 = smov (%p35_p5, %s3489_s16), 0  ;;  %p3041_p9 = por %p260_p6, %p259_p4 }
  0x16   : > { %3466 = sst [smem:[#allocation13_spill]] %s3491_s16  ;;  %p333_p10 = pnand %p2317_p7, %p332_p8 }
  0x17   : > { %s3467_s18 = scalar_select %p3041_p9, 1, 0 }
  0x18   : > { %s240_s19 = ssub.s32 %s2928_s11, %s3491_s16  ;;  %s243_s20 = sadd.s32 1, %s2912_s29 }
  0x19   : > { %3468 = sst [smem:[#allocation14_spill]] %s3467_s18  ;;  %p241_p11 = scmp.eq.s32.totalorder %s240_s19, 0 }
  0x1a   : > { %336 = sbr.rel (%p333_p10) target bundleno = 2706 (0xa92), region = 52  ;;  %s3444_s22 = sand.u32 (!%p333_p10), 1, %s2908_s28  }
  0x1b   : > { %s3049_s21 = scalar_select %p241_p11, %s2912_s29, %s243_s20  }
  0x1c   : > { %p391_p12 = scmp.lt.s32.totalorder (!%p333_p10), %s2920_s9, 1  ;;  %s3055_s23 = sshll.u32 (!%p333_p10), %s3444_s22, 3 }
  0x1d   : > { %3469 = sst [smem:[#allocation15_spill]] %s3049_s21  ;;  %p395_p13 = scmp.lt.s32.totalorder (!%p333_p10), %s2916_s30, 1 }
  0x1e   : > { %s3470_s0 = sld [smem:[#allocation16_spill]] (!%p333_p10)  ;;  %s3471_s1 = sld [smem:[#allocation17_spill]] (!%p333_p10) }
  0x1f   : > { %p2327_p0 = scmp.ne.s32.totalorder (!%p333_p10), %s2916_s30, 0 }
  0x21   : > { %s392_s24 = scalar_select %p391_p12, %s2920_s9, 1 }
  0x22   : > { %s3060_s25 = scalar_select %p395_p13, %s2916_s30, 1 }
  0x23   : > { %s2319_s26 = sshll.u32 %s392_s24, 3  ;;  %vm427_vm0 = vcmask (!%p2327_p0), 261120  }
  0x24   : > { %s394_s19 = scalar_lea.vmem %s3470_s0, %s2319_s26  ;;  %s2320_s20 = sshll.u32 %s3060_s25, 3 }
  0x25   : > { %s3069_s15 = scalar_lea.vmem %s3471_s1, %s2320_s20  ;;  %s2698_s11 = smul.u32 12, %s3060_s25  ;;  %v426_v0 = vld [vmem:[%s394_s19] sm:$0xff] (!%p2327_p0) }
  0x26   : > { %s2415_s10 = sshll.u32 %s3060_s25, 8  ;;  %s2416_s21 = sshll.u32 %s3060_s25, 4  ;;  %428 = vst.msk [vmem:[#allocation2] sm:$0xff] (!%p2327_p0), %vm427_vm0, %v426_v0 }
  0x27   : > { %s3077_s27 = scalar_lea.vmem %s3436_s2, %s2698_s11  ;;  %s3082_s8 = scalar_lea.vmem %s3437_s3, %s2415_s10 }
  0x28   : > { %s3087_s14 = scalar_lea.vmem %s3438_s4, %s2416_s21  ;;  %s415_s20 = scalar_lea.vmem %s3439_s5, %s3060_s25 }
  0x29   : > { %s2417_s0 = sshll.u32 %s3060_s25, 6  ;;  %s390_s11 = scalar_lea.vmem [#allocation3], %s3055_s23 }
  0x2a   : > { %s3097_s29 = scalar_lea.vmem %s3440_s6, %s2417_s0  ;;  %425 = sbr.rel (%p2327_p0) target bundleno = 49 (0x31), region = 56 }
  0x31 PF: > { %v3101_v1 = vld [vmem:[#allocation2] sm:$0xff]  ;;  %vm431_vm1 = vcmask 261120   ;;  %v2773_v9 = vld [vmem:[%s3082_s8 + $0x30] sm:$0xff]   ;;  %v2934_v10 = vmov 0.0   ;;  %v2774_v11 = vld [vmem:[%s3082_s8 + $0x8] sm:$0xff]   ;;  %vm2935_vm2 = vmmov 0   ;;  %v446_v15 = vlaneseq }
  0x32   : > { %v432_v2 = vsel %vm431_vm1, %v3101_v1, 0.0  ;;  %v2772_v8 = vld [vmem:[%s3082_s8] sm:$0xff]   ;;  %2494 = vmatprep.subr.bf16.mxu0 %v2934_v10  ;;  %2518 = vmatprep.subr.bf16.mxu1 %v2934_v10  ;;  %v2775_v12 = vld [vmem:[%s3082_s8 + $0x38] sm:$0xff]   ;;  %v2776_v27 = vld [vmem:[%s3082_s8 + $0x10] sm:$0xff]   ;;  %vm1248_vm3 = vcmask 64512   ;;  %vm1484_vm4 = vcmask 1043456  }
  0x33   : > { %433 = vadd.xlane.f32.xlu0 %v432_v2  ;;  %2495 = vmatpush3.bf16.msra.mxu0 %v2772_v8  ;;  %v3121_v17 = vshrl.u32 %v446_v15, 7  ;;  %v3125_v19 = vld [vmem:[%s3069_s15] sm:$0x3f]  ;;  %v2777_v28 = vld [vmem:[%s3082_s8 + $0x50] sm:$0xff]   ;;  %v2778_v30 = vld [vmem:[%s3082_s8 + $0x18] sm:$0xff]   ;;  %p2408_p1 = scmp.ne.s32.totalorder %s2916_s30, 1 }
  0x34   : > { %2519 = vmatpush3.bf16.msra.mxu1 %v2773_v9  ;;  %2496 = vmatprep.subr.bf16.mxu0 %v2934_v10  ;;  %v2779_v31 = vld [vmem:[%s3082_s8 + $0x58] sm:$0xff]   ;;  %v2780_v32 = vld [vmem:[%s3082_s8 + $0x20] sm:$0xff]   ;;  %v2781_v33 = vld [vmem:[%s3082_s8 + $0x70] sm:$0xff]  }
  0x35   : > { %2520 = vmatprep.subr.bf16.mxu1 %v2934_v10  ;;  %2498 = vmatprep.mubr.msk.bf16.mxu0 %vm2935_vm2, %v2934_v10  ;;  %v448_v18 = vsub.s32 0, %v3121_v17  ;;  %v453_v20 = vsub.s32 1, %v3121_v17  ;;  %v2782_v34 = vld [vmem:[%s3082_s8 + $0x28] sm:$0xff]   ;;  %v2783_v35 = vld [vmem:[%s3082_s8 + $0x78] sm:$0xff]   ;;  %v2784_v36 = vld [vmem:[%s3082_s8 + $0x40] sm:$0xff]  }
  0x36   : > { %2522 = vmatprep.mubr.msk.bf16.mxu1 %vm2935_vm2, %v2934_v10  ;;  %v2785_v37 = vld [vmem:[%s3082_s8 + $0x90] sm:$0xff]   ;;  %v2786_v38 = vld [vmem:[%s3082_s8 + $0x48] sm:$0xff]   ;;  %v2787_v39 = vld [vmem:[%s3082_s8 + $0x98] sm:$0xff]  }
  0x37   : > { %2497 = vmatpush3.bf16.msra.mxu0 %v2774_v11  ;;  %v449_v21 = vrot.slane %v3125_v19, %v448_v18  ;;  %v454_v23 = vrot.slane %v3125_v19, %v453_v20  ;;  %v2788_v40 = vld [vmem:[%s3082_s8 + $0x60] sm:$0xff]   ;;  %v2789_v41 = vld [vmem:[%s3082_s8 + $0xb0] sm:$0xff]   ;;  %v2790_v42 = vld [vmem:[%s3082_s8 + $0x68] sm:$0xff]  }
  0x38   : > { %2521 = vmatpush3.bf16.msra.mxu1 %v2775_v12  ;;  %2502 = vmatprep.subr.bf16.mxu0 %v2934_v10  ;;  %v2791_v43 = vld [vmem:[%s3082_s8 + $0xb8] sm:$0xff]   ;;  %v2792_v44 = vld [vmem:[%s3082_s8 + $0x80] sm:$0xff]   ;;  %v2793_v45 = vld [vmem:[%s3082_s8 + $0x88] sm:$0xff]  }
  0x39   : > { %2534 = vmatprep.subr.bf16.mxu1 %v2934_v10  ;;  %v2794_v46 = vld [vmem:[%s3082_s8 + $0xa0] sm:$0xff]   ;;  %v2795_v47 = vld [vmem:[%s3082_s8 + $0xa8] sm:$0xff]  }
  0x3a   : > { %v2333_v56 = vld [vmem:[%s3077_s27 + $0x5] ss:$0 sm:$0xff]  ;;  %v2329_v57 = vld [vmem:[%s3077_s27 + $0x1] ss:$0 sm:$0xff]  ;;  %v2331_v9 = vld [vmem:[%s3077_s27 + $0x3] ss:$0 sm:$0xff] }
  0xc0   : > { %v434_v3 = vpop.xlane.xlu0 %433 }
  0xc1   : > { %v436_v4 = vmul.f32 0.03125, %v434_v3 }
  0xc3   : > { %v437_v5 = vsub.f32 %v3101_v1, %v436_v4 }
  0xc5   : > { %v438_v6 = vmul.f32 %v437_v5, %v437_v5 }
  0xc7   : > { %v439_v7 = vsel %vm431_vm1, %v438_v6, 0.0 }
  0xc8   : > { %440 = vadd.xlane.f32.xlu0 %v439_v7  ;;  %v2335_v7 = vld [vmem:[%s3077_s27 + $0x7] ss:$0 sm:$0xff] }
 0x155   : > { %v441_v13 = vpop.xlane.xlu0 %440 }
 0x156   : > { %v442_v14 = vmul.f32 0.03125, %v441_v13 }
 0x158   : > { %v443_v16 = vadd.f32 1e-05, %v442_v14 }
 0x15a   : > { %2814 = vrsqrt.f32 %v443_v16 }
 0x164   : > { %v2815_v22 = vpop.eup %2814 }
 0x165   : > { %v445_v24 = vmul.f32 %v2815_v22, %v437_v5 }
 0x167   : > { %v450_v25 = vmul.f32 %v449_v21, %v445_v24 }
 0x169   : > { %v455_v26 = vadd.f32 %v454_v23, %v450_v25 }
 0x16b   : > { %v3132_v29 = vpack.c.bf16 %v455_v26, %v455_v26  ;;  %v2332_v26 = vld [vmem:[%s3077_s27 + $0x4] ss:$0 sm:$0xff] }
 0x16d   : > { %2499 = vmatmul.mubr.msk.bf16.vlgmr.msra.gmra.mrb[0].mxu0 %vm431_vm1, %v3132_v29  ;;  %2523 = vmatmul.mubr.msk.bf16.vlgmr.msra.gmra.mrb[0].mxu1 %vm431_vm1, %v3132_v29 }
 0x16e   : > { %2503 = vmatpush3.bf16.msra.mxu0 %v2776_v27  ;;  %2535 = vmatpush3.bf16.msra.mxu1 %v2777_v28  ;;  %v2337_v27 = vld [vmem:[%s3077_s27 + $0x9] ss:$0 sm:$0xff] }
 0x16f   : > { %2504 = vmatprep.subr.bf16.mxu0 %v2934_v10  ;;  %2536 = vmatprep.subr.bf16.mxu1 %v2934_v10 }
 0x170   : > { %2506 = vmatprep.mubr.msk.bf16.mxu0 %vm2935_vm2, %v2934_v10  ;;  %2538 = vmatprep.mubr.msk.bf16.mxu1 %vm2935_vm2, %v2934_v10 }
 0x172   : > { %2505 = vmatpush3.bf16.msra.mxu0 %v2778_v30  ;;  %2537 = vmatpush3.bf16.msra.mxu1 %v2779_v31 }
 0x173   : > { %2510 = vmatprep.subr.bf16.mxu0 %v2934_v10  ;;  %2550 = vmatprep.subr.bf16.mxu1 %v2934_v10 }
 0x175   : > { %2507 = vmatmul.mubr.msk.bf16.vlgmr.msra.gmra.mrb[4].mxu0 %vm431_vm1, %v3132_v29  ;;  %2539 = vmatmul.mubr.msk.bf16.vlgmr.msra.gmra.mrb[4].mxu1 %vm431_vm1, %v3132_v29 }
 0x176   : > { %2511 = vmatpush3.bf16.msra.mxu0 %v2780_v32  ;;  %2551 = vmatpush3.bf16.msra.mxu1 %v2781_v33 }
 0x177   : > { %2512 = vmatprep.subr.bf16.mxu0 %v2934_v10  ;;  %2552 = vmatprep.subr.bf16.mxu1 %v2934_v10 }
 0x178   : > { %2514 = vmatprep.mubr.msk.bf16.mxu0 %vm2935_vm2, %v2934_v10  ;;  %2554 = vmatprep.mubr.msk.bf16.mxu1 %vm2935_vm2, %v2934_v10 }
 0x17a   : > { %2513 = vmatpush3.bf16.msra.mxu0 %v2782_v34  ;;  %2553 = vmatpush3.bf16.msra.mxu1 %v2783_v35 }
 0x17b   : > { %2526 = vmatprep.subr.bf16.mxu0 %v2934_v10  ;;  %2566 = vmatprep.subr.bf16.mxu1 %v2934_v10 }
 0x17d   : > { %2515 = vmatmul.mubr.msk.bf16.vlgmr.msra.gmra.mrb[8].mxu0 %vm431_vm1, %v3132_v29  ;;  %2555 = vmatmul.mubr.msk.bf16.vlgmr.msra.gmra.mrb[8].mxu1 %vm431_vm1, %v3132_v29 }
 0x17e   : > { %2527 = vmatpush3.bf16.msra.mxu0 %v2784_v36  ;;  %2567 = vmatpush3.bf16.msra.mxu1 %v2785_v37 }
 0x17f   : > { %2528 = vmatprep.subr.bf16.mxu0 %v2934_v10  ;;  %2568 = vmatprep.subr.bf16.mxu1 %v2934_v10 }
 0x180   : > { %2530 = vmatprep.mubr.msk.bf16.mxu0 %vm2935_vm2, %v2934_v10  ;;  %2570 = vmatprep.mubr.msk.bf16.mxu1 %vm2935_vm2, %v2934_v10 }
 0x182   : > { %2529 = vmatpush3.bf16.msra.mxu0 %v2786_v38  ;;  %2569 = vmatpush3.bf16.msra.mxu1 %v2787_v39 }
 0x183   : > { %2542 = vmatprep.subr.bf16.mxu0 %v2934_v10  ;;  %2582 = vmatprep.subr.bf16.mxu1 %v2934_v10 }
 0x185   : > { %2531 = vmatmul.mubr.msk.bf16.vlgmr.msra.gmra.mrb[12].mxu0 %vm431_vm1, %v3132_v29  ;;  %2571 = vmatmul.mubr.msk.bf16.vlgmr.msra.gmra.mrb[12].mxu1 %vm431_vm1, %v3132_v29 }
 0x186   : > { %2543 = vmatpush3.bf16.msra.mxu0 %v2788_v40  ;;  %2583 = vmatpush3.bf16.msra.mxu1 %v2789_v41 }
 0x187   : > { %2544 = vmatprep.subr.bf16.mxu0 %v2934_v10  ;;  %2584 = vmatprep.subr.bf16.mxu1 %v2934_v10 }
 0x188   : > { %2546 = vmatprep.mubr.msk.bf16.mxu0 %vm2935_vm2, %v2934_v10  ;;  %2586 = vmatprep.mubr.msk.bf16.mxu1 %vm2935_vm2, %v2934_v10 }
 0x18a   : > { %2545 = vmatpush3.bf16.msra.mxu0 %v2790_v42  ;;  %2585 = vmatpush3.bf16.msra.mxu1 %v2791_v43 }
 0x18b   : > { %2558 = vmatprep.subr.bf16.mxu0 %v2934_v10  ;;  %2596 = vmatprep.subr.bf16.mxu1 %v2934_v10 }
 0x18d   : > { %2547 = vmatmul.mubr.msk.bf16.vlgmr.msra.gmra.mrb[16].mxu0 %vm431_vm1, %v3132_v29  ;;  %2587 = vmatmul.mubr.msk.bf16.vlgmr.msra.gmra.mrb[16].mxu1 %vm431_vm1, %v3132_v29 }
 0x18e   : > { %2559 = vmatpush3.bf16.msra.mxu0 %v2792_v44  ;;  %2562 = vmatprep.mubr.msk.bf16.mxu0 %vm2935_vm2, %v2934_v10 }
 0x18f   : > { %2560 = vmatprep.subr.bf16.mxu0 %v2934_v10  ;;  %2598 = vmatprep.mubr.msk.bf16.mxu1 %vm2935_vm2, %v2934_v10 }
 0x192   : > { %2561 = vmatpush3.bf16.msra.mxu0 %v2793_v45 }
 0x193   : > { %2574 = vmatprep.subr.bf16.mxu0 %v2934_v10 }
 0x195   : > { %2563 = vmatmul.mubr.msk.bf16.vlgmr.msra.gmra.mrb[20].mxu0 %vm431_vm1, %v3132_v29 }
 0x196   : > { %2575 = vmatpush3.bf16.msra.mxu0 %v2794_v46  ;;  %2578 = vmatprep.mubr.msk.bf16.mxu0 %vm2935_vm2, %v2934_v10  ;;  %v2334_v46 = vld [vmem:[%s3077_s27 + $0x6] ss:$0 sm:$0xff] }
 0x197   : > { %2576 = vmatprep.subr.bf16.mxu0 %v2934_v10 }
 0x19a   : > { %2577 = vmatpush3.bf16.msra.mxu0 %v2795_v47  ;;  %v2339_v47 = vld [vmem:[%s3077_s27 + $0xb] ss:$0 sm:$0xff] }
 0x19b   : > { %2590 = vmatprep.subr.bf16.mxu0 %v2934_v10 }
 0x19d   : > { %2579 = vmatmul.mubr.msk.bf16.vlgmr.msra.gmra.mrb[24].mxu0 %vm431_vm1, %v3132_v29  ;;  %v2328_v29 = vld [vmem:[%s3077_s27] ss:$0 sm:$0xff] }
 0x19e   : > { %2592 = vmatprep.mubr.msk.bf16.mxu0 %vm2935_vm2, %v2934_v10 }
 0x240   : > { %v654_v48 = vpop.f32.mrb[0].mxu0  ;;  %v810_v49 = vpop.f32.mrb[0].mxu1 }
 0x241   : > { %v2500_v50 = vpop.f32.mrb[1].mxu0  ;;  %v2524_v51 = vpop.f32.mrb[1].mxu1  ;;  %v811_v20 = vadd.f32 %v2331_v9, %v810_v49  ;;  %v655_v38 = vadd.f32 %v2328_v29, %v654_v48  ;;  %v2330_v48 = vld [vmem:[%s3077_s27 + $0x2] ss:$0 sm:$0xff] }
 0x242   : > { %v657_v52 = vpop.f32.mrb[2].mxu0  ;;  %v813_v53 = vpop.f32.mrb[2].mxu1 }
 0x243   : > { %v2501_v54 = vpop.f32.mrb[3].mxu0  ;;  %v2525_v55 = vpop.f32.mrb[3].mxu1  ;;  %v1235_v28 = vmul.f32 0.35355338, %v811_v20  ;;  %v1232_v49 = vmul.f32 0.35355338, %v655_v38 }
 0x245   : > { %v1239_v39 = vpack.c.bf16 %v1235_v28, %v1235_v28 }
 0x248   : > { %v706_v58 = vpop.f32.mrb[4].mxu0  ;;  %v914_v59 = vpop.f32.mrb[4].mxu1 }
 0x249   : > { %v915_v60 = vadd.f32 %v2333_v56, %v914_v59  ;;  %v2508_v61 = vpop.f32.mrb[5].mxu0  ;;  %v2540_v62 = vpop.f32.mrb[5].mxu1  ;;  %v707_v2 = vadd.f32 %v2329_v57, %v706_v58  ;;  %v1236_v58 = vpack.c.bf16 %v1232_v49, %v1232_v49 }
 0x24a   : > { %v709_v63 = vpop.f32.mrb[6].mxu0  ;;  %v917_v0 = vpop.f32.mrb[6].mxu1 }
 0x24b   : > { %v1241_v3 = vpack.c.bf16 %v915_v60, %v915_v60  ;;  %v2509_v4 = vpop.f32.mrb[7].mxu0  ;;  %v2541_v5 = vpop.f32.mrb[7].mxu1  ;;  %v1233_v8 = vmul.f32 0.35355338, %v707_v2 }
 0x24d   : > { %v1299_v6 = vsel %vm1248_vm3, %v1241_v3, 0  ;;  %v1237_v21 = vpack.c.bf16 %v1233_v8, %v1233_v8  ;;  %v2336_v3 = vld [vmem:[%s3077_s27 + $0x8] ss:$0 sm:$0xff] }
 0x24e   : > { %2597 = vmatpush3.bf16.xpose.msra.mxu1 %v1299_v6 }
 0x24f   : > { %2608 = vmatprep.subr.bf16.mxu1 %v2934_v10 }
 0x250   : > { %v758_v11 = vpop.f32.mrb[8].mxu0  ;;  %v1018_v12 = vpop.f32.mrb[8].mxu1 }
 0x251   : > { %v1019_v13 = vadd.f32 %v2335_v7, %v1018_v12  ;;  %v2516_v14 = vpop.f32.mrb[9].mxu0  ;;  %v2556_v15 = vpop.f32.mrb[9].mxu1  ;;  %v759_v59 = vadd.f32 %v2330_v48, %v758_v11 }
 0x252   : > { %v761_v16 = vpop.f32.mrb[10].mxu0  ;;  %v1021_v18 = vpop.f32.mrb[10].mxu1  ;;  %v2338_v14 = vld [vmem:[%s3077_s27 + $0xa] ss:$0 sm:$0xff] }
 0x253   : > { %v1243_v22 = vpack.c.bf16 %v1019_v13, %v1019_v13  ;;  %v2517_v23 = vpop.f32.mrb[11].mxu0  ;;  %v2557_v24 = vpop.f32.mrb[11].mxu1  ;;  %v1234_v4 = vmul.f32 0.35355338, %v759_v59 }
 0x255   : > { %v1391_v25 = vsel %vm1248_vm3, %v1243_v22, 0  ;;  %2599 = vmatmul.mubr.msk.bf16.vlgmr.msra.gmra.mrb[20].mxu1 %vm1248_vm3, %v1237_v21  ;;  %v1238_v9 = vpack.c.bf16 %v1234_v4, %v1234_v4 }
 0x256   : > { %2609 = vmatpush3.bf16.xpose.msra.mxu1 %v1391_v25  ;;  %2610 = vmatprep.mubr.msk.bf16.mxu1 %vm2935_vm2, %v2934_v10 }
 0x257   : > { %2620 = vmatprep.subr.bf16.mxu1 %v2934_v10 }
 0x258   : > { %v862_v30 = vpop.f32.mrb[12].mxu0  ;;  %v1122_v31 = vpop.f32.mrb[12].mxu1 }
 0x259   : > { %v863_v32 = vadd.f32 %v2332_v26, %v862_v30  ;;  %v1123_v33 = vadd.f32 %v2337_v27, %v1122_v31  ;;  %v2532_v34 = vpop.f32.mrb[13].mxu0  ;;  %v2572_v35 = vpop.f32.mrb[13].mxu1 }
 0x25a   : > { %v865_v36 = vpop.f32.mrb[14].mxu0  ;;  %v1125_v37 = vpop.f32.mrb[14].mxu1 }
 0x25b   : > { %v1240_v40 = vpack.c.bf16 %v863_v32, %v863_v32  ;;  %v1245_v41 = vpack.c.bf16 %v1123_v33, %v1123_v33  ;;  %v2533_v42 = vpop.f32.mrb[15].mxu0  ;;  %v2573_v43 = vpop.f32.mrb[15].mxu1 }
 0x25d   : > { %v1253_v44 = vsel %vm1248_vm3, %v1240_v40, 0  ;;  %v1532_v45 = vsel %vm1484_vm4, %v1245_v41, 0  ;;  %2611 = vmatmul.mubr.msk.bf16.vlgmr.msra.gmra.mrb[24].mxu1 %vm1248_vm3, %v1239_v39 }
 0x25e   : > { %2591 = vmatpush3.bf16.xpose.msra.mxu0 %v1253_v44  ;;  %2621 = vmatpush3.bf16.msra.mxu1 %v1532_v45 }
 0x25f   : > { %2602 = vmatprep.subr.bf16.mxu0 %v2934_v10  ;;  %2622 = vmatprep.mubr.msk.bf16.mxu1 %vm2935_vm2, %v2934_v10 }
 0x260   : > { %v966_v50 = vpop.f32.mrb[16].mxu0  ;;  %v1226_v51 = vpop.f32.mrb[16].mxu1  ;;  %2632 = vmatprep.subr.bf16.mxu1 %v2934_v10 }
 0x261   : > { %v967_v52 = vadd.f32 %v2334_v46, %v966_v50  ;;  %v1227_v53 = vadd.f32 %v2339_v47, %v1226_v51  ;;  %v2548_v54 = vpop.f32.mrb[17].mxu0  ;;  %v2588_v55 = vpop.f32.mrb[17].mxu1 }
 0x262   : > { %v969_v56 = vpop.f32.mrb[18].mxu0  ;;  %v1229_v57 = vpop.f32.mrb[18].mxu1 }
 0x263   : > { %v1242_v60 = vpack.c.bf16 %v967_v52, %v967_v52  ;;  %v1247_v61 = vpack.c.bf16 %v1227_v53, %v1227_v53  ;;  %v2549_v62 = vpop.f32.mrb[19].mxu0  ;;  %v2589_v63 = vpop.f32.mrb[19].mxu1 }
 0x265   : > { %v1345_v0 = vsel %vm1248_vm3, %v1242_v60, 0  ;;  %v3246_v2 = vsel %vm1484_vm4, %v1247_v61, 0  ;;  %2593 = vmatmul.mubr.msk.bf16.vlgmr.msra.gmra.mrb[28].mxu0 %vm1248_vm3, %v1236_v58 }
 0x266   : > { %2603 = vmatpush3.bf16.xpose.msra.mxu0 %v1345_v0  ;;  %2604 = vmatprep.mubr.msk.bf16.mxu0 %vm2935_vm2, %v2934_v10 }
 0x267   : > { %2614 = vmatprep.subr.bf16.mxu0 %v2934_v10 }
 0x268   : > { %v1070_v5 = vpop.f32.mrb[20].mxu0 }
 0x269   : > { %v1071_v6 = vadd.f32 %v2336_v3, %v1070_v5  ;;  %v2564_v7 = vpop.f32.mrb[21].mxu0 }
 0x26a   : > { %v1073_v8 = vpop.f32.mrb[22].mxu0 }
 0x26b   : > { %v1244_v11 = vpack.c.bf16 %v1071_v6, %v1071_v6  ;;  %v2565_v12 = vpop.f32.mrb[23].mxu0 }
 0x26d   : > { %v1486_v13 = vsel %vm1484_vm4, %v1244_v11, 0  ;;  %2605 = vmatmul.mubr.msk.bf16.vlgmr.msra.gmra.mrb[32].mxu0 %vm1248_vm3, %v1238_v9 }
 0x26e   : > { %2615 = vmatpush3.bf16.msra.mxu0 %v1486_v13  ;;  %2616 = vmatprep.mubr.msk.bf16.mxu0 %vm2935_vm2, %v2934_v10 }
 0x26f   : > { %2626 = vmatprep.subr.bf16.mxu0 %v2934_v10 }
 0x270   : > { %v1174_v15 = vpop.f32.mrb[24].mxu0 }
 0x271   : > { %v1175_v16 = vadd.f32 %v2338_v14, %v1174_v15  ;;  %v2580_v18 = vpop.f32.mrb[25].mxu0  ;;  %v2796_v14 = vld [vmem:[%s3082_s8 + $0xc0] sm:$0xff]  }
 0x272   : > { %v1177_v20 = vpop.f32.mrb[26].mxu0 }
 0x273   : > { %v1246_v21 = vpack.c.bf16 %v1175_v16, %v1175_v16  ;;  %v2581_v22 = vpop.f32.mrb[27].mxu0 }
 0x274   : > { %v2797_v22 = vld [vmem:[%s3082_s8 + $0xd0] sm:$0xff]  }
 0x275   : > { %v3260_v23 = vsel %vm1484_vm4, %v1246_v21, 0  ;;  %v1684_v21 = vsel %vm1248_vm3, %v2796_v14, 0 }
 0x328   : > { %v1335_v24 = vpop.f32.mrb[20].mxu1 }
 0x329   : > { %v2600_v25 = vpop.f32.mrb[21].mxu1  ;;  %v1436_v37 = vsel %vm1248_vm3, %v1335_v24, -inf }
 0x32a   : > { %v1338_v26 = vpop.f32.mrb[22].mxu1 }
 0x32b   : > { %v2601_v27 = vpop.f32.mrb[23].mxu1  ;;  %v2799_v26 = vld [vmem:[%s3082_s8 + $0xd8] sm:$0xff]  }
 0x32c   : > { %v1746_v27 = vsel %vm1248_vm3, %v2799_v26, 0 }
 0x330   : > { %v1427_v28 = vpop.f32.mrb[24].mxu1 }
 0x331   : > { %v2612_v29 = vpop.f32.mrb[25].mxu1  ;;  %v1442_v40 = vsel %vm1248_vm3, %v1427_v28, -inf }
 0x332   : > { %v1430_v30 = vpop.f32.mrb[26].mxu1 }
 0x333   : > { %v2613_v31 = vpop.f32.mrb[27].mxu1 }
 0x338   : > { %v1289_v32 = vpop.f32.mrb[28].mxu0 }
 0x339   : > { %v2594_v33 = vpop.f32.mrb[29].mxu0  ;;  %v1433_v34 = vsel %vm1248_vm3, %v1289_v32, -inf }
 0x33a   : > { %1434 = vmax.xlane.f32.xlu1 %v1433_v34  ;;  %v1292_v35 = vpop.f32.mrb[30].mxu0  ;;  %v2801_v33 = vld [vmem:[%s3082_s8 + $0xf0] sm:$0xff]  }
 0x33b   : > { %v2595_v36 = vpop.f32.mrb[31].mxu0 }
 0x33e   : > { %1437 = vmax.xlane.f32.xlu1 %v1436_v37 }
 0x340   : > { %v1381_v38 = vpop.f32.mrb[32].mxu0 }
 0x341   : > { %v2606_v39 = vpop.f32.mrb[33].mxu0  ;;  %v1439_v41 = vsel %vm1248_vm3, %v1381_v38, -inf }
 0x342   : > { %1443 = vmax.xlane.f32.xlu1 %v1442_v40  ;;  %1440 = vmax.xlane.f32.xlu0 %v1439_v41  ;;  %v1384_v42 = vpop.f32.mrb[34].mxu0  ;;  %v1861_v39 = vsel %vm1248_vm3, %v2801_v33, 0  ;;  %v2802_v40 = vld [vmem:[%s3082_s8 + $0xe8] sm:$0xff]  }
 0x343   : > { %v2607_v43 = vpop.f32.mrb[35].mxu0 }
 0x3c7   : > { %v1435_v44 = vpop.xlane.xlu1 %1434 }
 0x3c8   : > { %v1445_v45 = vsub.f32 %v1289_v32, %v1435_v44  ;;  %v1805_v44 = vsel %vm1248_vm3, %v2802_v40, 0 }
 0x3ca   : > { %v1449_v46 = vmul.f32 1.442695, %v1445_v45  ;;  %v2803_v45 = vld [vmem:[%s3082_s8 + $0xf8] sm:$0xff]  }
 0x3cb   : > { %v1438_v47 = vpop.xlane.xlu1 %1437 }
 0x3cc   : > { %2816 = vpow2.f32 %v1449_v46  ;;  %v1446_v49 = vsub.f32 %v1335_v24, %v1438_v47  ;;  %v2798_v24 = vld [vmem:[%s3082_s8 + $0xc8] sm:$0xff]  }
 0x3cd   : > { %v1687_v25 = vsel %vm1248_vm3, %v2798_v24, 0 }
 0x3ce   : > { %v1451_v48 = vmul.f32 1.442695, %v1446_v49 }
 0x3cf   : > { %v1444_v50 = vpop.xlane.xlu1 %1443  ;;  %v1441_v51 = vpop.xlane.xlu0 %1440 }
 0x3d0   : > { %2818 = vpow2.f32 %v1451_v48  ;;  %v1448_v52 = vsub.f32 %v1427_v28, %v1444_v50  ;;  %v1447_v53 = vsub.f32 %v1381_v38, %v1441_v51  ;;  %v2800_v28 = vld [vmem:[%s3082_s8 + $0xe0] sm:$0xff]   ;;  %v1864_v51 = vsel %vm1248_vm3, %v2803_v45, 0  ;;  %v2809_v45 = vld [vmem:[%s3097_s29 + $0x18] sm:$0xff]  }
 0x3d1   : > { %v1802_v32 = vsel %vm1248_vm3, %v2800_v28, 0 }
 0x3d2   : > { %v1455_v54 = vmul.f32 1.442695, %v1448_v52  ;;  %v1453_v55 = vmul.f32 1.442695, %v1447_v53 }
 0x3d4   : > { %2820 = vpow2.f32 %v1455_v54 }
 0x3d5   : > { %2822 = vpow2.f32 %v1453_v55 }
 0x3d6   : > { %v2817_v56 = vpop.eup %2816 }
 0x3d7   : > { %v1457_v57 = vsel %vm1248_vm3, %v2817_v56, 0.0 }
 0x3d8   : > { %1458 = vadd.xlane.f32.xlu0 %v1457_v57 }
 0x3da   : > { %v2819_v58 = vpop.eup %2818 }
 0x3db   : > { %v1460_v59 = vsel %vm1248_vm3, %v2819_v58, 0.0 }
 0x3dc   : > { %1461 = vadd.xlane.f32.xlu1 %v1460_v59 }
 0x3de   : > { %v2821_v60 = vpop.eup %2820 }
 0x3df   : > { %v2823_v61 = vpop.eup %2822  ;;  %v1466_v62 = vsel %vm1248_vm3, %v2821_v60, 0.0 }
 0x3e0   : > { %1467 = vadd.xlane.f32.xlu1 %v1466_v62  ;;  %v1463_v63 = vsel %vm1248_vm3, %v2823_v61, 0.0 }
 0x3e1   : > { %1464 = vadd.xlane.f32.xlu0 %v1463_v63 }
 0x465   : > { %v1459_v0 = vpop.xlane.xlu0 %1458 }
 0x466   : > { %2824 = vrcp.f32 %v1459_v0 }
 0x469   : > { %v1462_v3 = vpop.xlane.xlu1 %1461 }
 0x46a   : > { %2826 = vrcp.f32 %v1462_v3 }
 0x46d   : > { %v1468_v4 = vpop.xlane.xlu1 %1467 }
 0x46e   : > { %2828 = vrcp.f32 %v1468_v4  ;;  %v1465_v5 = vpop.xlane.xlu0 %1464 }
 0x46f   : > { %2830 = vrcp.f32 %v1465_v5 }
 0x470   : > { %v2825_v6 = vpop.eup %2824 }
 0x471   : > { %v1470_v7 = vmul.f32 %v2825_v6, %v2817_v56 }
 0x473   : > { %v1477_v8 = vpack.c.bf16 %v1470_v7, %v1470_v7 }
 0x474   : > { %v2827_v9 = vpop.eup %2826 }
 0x475   : > { %v1472_v11 = vmul.f32 %v2827_v9, %v2819_v58  ;;  %2617 = vmatmul.mubr.msk.bf16.vlgmr.msra.gmra.mrb[36].mxu0 %vm1248_vm3, %v1477_v8 }
 0x476   : > { %2627 = vmatpush3.bf16.msra.mxu0 %v3260_v23  ;;  %2628 = vmatprep.mubr.msk.bf16.mxu0 %vm2935_vm2, %v2934_v10 }
 0x477   : > { %v1478_v12 = vpack.c.bf16 %v1472_v11, %v1472_v11  ;;  %2638 = vmatprep.subr.bf16.mxu0 %v2934_v10  ;;  %v1916_v11 = vsub.s32 2, %v3121_v17 }
 0x478   : > { %v2829_v13 = vpop.eup %2828 }
 0x479   : > { %v2831_v15 = vpop.eup %2830  ;;  %2623 = vmatmul.mubr.msk.bf16.vlgmr.msra.gmra.mrb[28].mxu1 %vm1248_vm3, %v1478_v12  ;;  %v1476_v18 = vmul.f32 %v2829_v13, %v2821_v60 }
 0x47a   : > { %v1474_v16 = vmul.f32 %v2831_v15, %v2823_v61  ;;  %2633 = vmatpush3.bf16.msra.mxu1 %v3246_v2  ;;  %2634 = vmatprep.mubr.msk.bf16.mxu1 %vm2935_vm2, %v2934_v10  ;;  %v1743_v2 = vsel %vm1248_vm3, %v2797_v22, 0 }
 0x47b   : > { %2646 = vmatprep.subr.bf16.mxu1 %v2934_v10  ;;  %v1480_v23 = vpack.c.bf16 %v1476_v18, %v1476_v18 }
 0x47c   : > { %v1479_v20 = vpack.c.bf16 %v1474_v16, %v1474_v16 }
 0x47e   : > { %2629 = vmatmul.mubr.msk.bf16.vlgmr.msra.gmra.mrb[40].mxu0 %vm1248_vm3, %v1479_v20  ;;  %v1917_v20 = vrot.slane %v3125_v19, %v1916_v11 }
 0x47f   : > { %2639 = vmatpush3.bf16.xpose.msra.mxu0 %v1684_v21  ;;  %2642 = vmatprep.mubr.msk.bf16.mxu0 %vm2935_vm2, %v2934_v10 }
 0x480   : > { %2640 = vmatprep.subr.bf16.mxu0 %v2934_v10 }
 0x481   : > { %2635 = vmatmul.mubr.msk.bf16.vlgmr.msra.gmra.mrb[32].mxu1 %vm1248_vm3, %v1480_v23 }
 0x482   : > { %2650 = vmatprep.mubr.msk.bf16.mxu1 %vm2935_vm2, %v2934_v10 }
 0x483   : > { %2647 = vmatpush3.bf16.xpose.msra.mxu1 %v1743_v2 }
 0x484   : > { %2648 = vmatprep.subr.bf16.mxu1 %v2934_v10 }
 0x487   : > { %2641 = vmatpush3.bf16.xpose.msra.mxu0 %v1687_v25 }
 0x488   : > { %2654 = vmatprep.subr.bf16.mxu0 %v2934_v10 }
 0x48b   : > { %2649 = vmatpush3.bf16.xpose.msra.mxu1 %v1746_v27 }
 0x48c   : > { %2662 = vmatprep.subr.bf16.mxu1 %v2934_v10 }
 0x548   : > { %v1522_v29 = vpop.f32.mrb[36].mxu0 }
 0x549   : > { %v1666_v30 = vpack.c.bf16 %v1522_v29, %v1522_v29  ;;  %v2618_v31 = vpop.f32.mrb[37].mxu0  ;;  %v2804_v29 = vld [vmem:[%s3087_s14] sm:$0xff]  }
 0x54a   : > { %v1525_v34 = vpop.f32.mrb[38].mxu0 }
 0x54b   : > { %v2619_v35 = vpop.f32.mrb[39].mxu0  ;;  %2643 = vmatmul.mubr.msk.bf16.vlgmr.msra.gmra.mrb[44].mxu0 %vm1248_vm3, %v1666_v30  ;;  %v2805_v30 = vld [vmem:[%s3087_s14 + $0x8] sm:$0xff]   ;;  %v1934_v34 = vsub.s32 3, %v3121_v17 }
 0x54c   : > { %2655 = vmatpush3.bf16.xpose.msra.mxu0 %v1802_v32  ;;  %v1568_v36 = vpop.f32.mrb[28].mxu1  ;;  %2658 = vmatprep.mubr.msk.bf16.mxu0 %vm2935_vm2, %v2934_v10  ;;  %v1939_v35 = vsub.s32 4, %v3121_v17 }
 0x54d   : > { %v1667_v37 = vpack.c.bf16 %v1568_v36, %v1568_v36  ;;  %v2624_v38 = vpop.f32.mrb[29].mxu1  ;;  %2656 = vmatprep.subr.bf16.mxu0 %v2934_v10  ;;  %v1935_v36 = vrot.slane %v3125_v19, %v1934_v34 }
 0x54e   : > { %v1571_v41 = vpop.f32.mrb[30].mxu1 }
 0x54f   : > { %v2625_v42 = vpop.f32.mrb[31].mxu1  ;;  %2651 = vmatmul.mubr.msk.bf16.vlgmr.msra.gmra.mrb[36].mxu1 %vm1248_vm3, %v1667_v37 }
 0x550   : > { %2663 = vmatpush3.bf16.xpose.msra.mxu1 %v1861_v39  ;;  %2666 = vmatprep.mubr.msk.bf16.mxu1 %vm2935_vm2, %v2934_v10  ;;  %v1940_v39 = vrot.slane %v3125_v19, %v1939_v35 }
 0x551   : > { %v1614_v43 = vpop.f32.mrb[40].mxu0  ;;  %2664 = vmatprep.subr.bf16.mxu1 %v2934_v10 }
 0x552   : > { %v2630_v46 = vpop.f32.mrb[41].mxu0  ;;  %v1668_v54 = vpack.c.bf16 %v1614_v43, %v1614_v43  ;;  %v2807_v43 = vld [vmem:[%s3097_s29 + $0x8] sm:$0xff]  }
 0x553   : > { %v1617_v47 = vpop.f32.mrb[42].mxu0  ;;  %v2810_v46 = vld [vmem:[%s3097_s29 + $0x20] sm:$0xff]  }
 0x554   : > { %v2631_v49 = vpop.f32.mrb[43].mxu0  ;;  %2657 = vmatpush3.bf16.xpose.msra.mxu0 %v1805_v44  ;;  %v1660_v48 = vpop.f32.mrb[32].mxu1  ;;  %v2808_v44 = vld [vmem:[%s3097_s29 + $0x10] sm:$0xff]   ;;  %v2811_v47 = vld [vmem:[%s3097_s29 + $0x28] sm:$0xff]  }
 0x555   : > { %v2636_v50 = vpop.f32.mrb[33].mxu1  ;;  %2670 = vmatprep.subr.bf16.mxu0 %v2934_v10  ;;  %v1669_v55 = vpack.c.bf16 %v1660_v48, %v1660_v48  ;;  %v2812_v49 = vld [vmem:[%s3097_s29 + $0x30] sm:$0xff]   ;;  %v2813_v48 = vld [vmem:[%s3097_s29 + $0x38] sm:$0xff]  }
 0x556   : > { %v1663_v52 = vpop.f32.mrb[34].mxu1  ;;  %v2396_v50 = vld [vmem:[%s415_s20] ss:$0 sm:$0xff] }
 0x557   : > { %v2637_v53 = vpop.f32.mrb[35].mxu1 }
 0x558   : > { %2665 = vmatpush3.bf16.xpose.msra.mxu1 %v1864_v51 }
 0x559   : > { %2678 = vmatprep.subr.bf16.mxu1 %v2934_v10 }
 0x55b   : > { %2659 = vmatmul.mubr.msk.bf16.vlgmr.msra.gmra.mrb[48].mxu0 %vm1248_vm3, %v1668_v54 }
 0x55c   : > { %2674 = vmatprep.mubr.msk.bf16.mxu0 %vm2935_vm2, %v2934_v10  ;;  %2671 = vmatpush3.bf16.msra.mxu0 %v2804_v29 }
 0x55d   : > { %2672 = vmatprep.subr.bf16.mxu0 %v2934_v10 }
 0x55f   : > { %2667 = vmatmul.mubr.msk.bf16.vlgmr.msra.gmra.mrb[40].mxu1 %vm1248_vm3, %v1669_v55 }
 0x560   : > { %2694 = vmatprep.mubr.msk.bf16.mxu1 %vm2935_vm2, %v2934_v10  ;;  %2673 = vmatpush3.bf16.msra.mxu0 %v2805_v30 }
 0x61e   : > { %v1723_v56 = vpop.f32.mrb[44].mxu0 }
 0x61f   : > { %v2644_v57 = vpop.f32.mrb[45].mxu0  ;;  %v1906_v61 = vsel %vm431_vm1, %v1723_v56, 0.0 }
 0x620   : > { %v1726_v58 = vpop.f32.mrb[46].mxu0 }
 0x621   : > { %v2645_v59 = vpop.f32.mrb[47].mxu0 }
 0x622   : > { %v1782_v60 = vpop.f32.mrb[36].mxu1 }
 0x623   : > { %v1907_v62 = vsel %vm431_vm1, %v1782_v60, 0.0  ;;  %v2652_v63 = vpop.f32.mrb[37].mxu1 }
 0x624   : > { %v1908_v0 = vadd.f32 %v1907_v62, %v1906_v61  ;;  %v1785_v3 = vpop.f32.mrb[38].mxu1 }
 0x625   : > { %v2653_v4 = vpop.f32.mrb[39].mxu1  ;;  %v2126_v3 = vsub.s32 5, %v3121_v17 }
 0x627   : > { %v2127_v4 = vrot.slane %v3125_v19, %v2126_v3 }
 0x62e   : > { %v1841_v5 = vpop.f32.mrb[48].mxu0 }
 0x62f   : > { %v1909_v6 = vsel %vm431_vm1, %v1841_v5, 0.0  ;;  %v2660_v7 = vpop.f32.mrb[49].mxu0 }
 0x630   : > { %v1910_v8 = vadd.f32 %v1909_v6, %v1908_v0  ;;  %v1844_v9 = vpop.f32.mrb[50].mxu0 }
 0x631   : > { %v2661_v12 = vpop.f32.mrb[51].mxu0 }
 0x632   : > { %v1900_v13 = vpop.f32.mrb[40].mxu1 }
 0x633   : > { %v1911_v14 = vsel %vm431_vm1, %v1900_v13, 0.0  ;;  %v2668_v15 = vpop.f32.mrb[41].mxu1 }
 0x634   : > { %v1912_v16 = vadd.f32 %v1911_v14, %v1910_v8  ;;  %v1903_v18 = vpop.f32.mrb[42].mxu1 }
 0x635   : > { %v2669_v21 = vpop.f32.mrb[43].mxu1 }
 0x636   : > { %v1913_v22 = vadd.f32 %v1912_v16, %v3101_v1  ;;  %v2806_v1 = vld [vmem:[%s3097_s29] sm:$0xff]  }
 0x637   : > { %2679 = vmatpush3.bf16.msra.mxu1 %v2806_v1 }
 0x638   : > { %v3329_v23 = vadd.f32 %v1917_v20, %v1913_v22  ;;  %2680 = vmatprep.subr.bf16.mxu1 %v2934_v10  ;;  %v2409_v22 = vld [vmem:[%s3441_s7] ss:$0 sm:$0xff] (!%p2408_p1) }
 0x63a   : > { %v1919_v2 = vsel %vm431_vm1, %v3329_v23, 0.0 }
 0x63b   : > { %1920 = vadd.xlane.f32.xlu0 %v1919_v2  ;;  %2681 = vmatpush3.bf16.msra.mxu1 %v2807_v43  ;;  %v2410_v2 = vld [vmem:[%s3441_s7 + $0x1] ss:$0 sm:$0xff] (!%p2408_p1) }
 0x63c   : > { %2682 = vmatprep.subr.bf16.mxu1 %v2934_v10 }
 0x63f   : > { %2683 = vmatpush3.bf16.msra.mxu1 %v2808_v44 }
 0x640   : > { %2684 = vmatprep.subr.bf16.mxu1 %v2934_v10 }
 0x643   : > { %2685 = vmatpush3.bf16.msra.mxu1 %v2809_v45 }
 0x644   : > { %2686 = vmatprep.subr.bf16.mxu1 %v2934_v10 }
 0x647   : > { %2687 = vmatpush3.bf16.msra.mxu1 %v2810_v46 }
 0x648   : > { %2688 = vmatprep.subr.bf16.mxu1 %v2934_v10 }
 0x64b   : > { %2689 = vmatpush3.bf16.msra.mxu1 %v2811_v47 }
 0x64c   : > { %2690 = vmatprep.subr.bf16.mxu1 %v2934_v10 }
 0x64f   : > { %2691 = vmatpush3.bf16.msra.mxu1 %v2812_v49 }
 0x650   : > { %2692 = vmatprep.subr.bf16.mxu1 %v2934_v10 }
 0x653   : > { %2693 = vmatpush3.bf16.msra.mxu1 %v2813_v48 }
 0x6c8   : > { %v1921_v24 = vpop.xlane.xlu0 %1920 }
 0x6c9   : > { %v1922_v25 = vmul.f32 0.03125, %v1921_v24 }
 0x6cb   : > { %v1923_v26 = vsub.f32 %v3329_v23, %v1922_v25 }
 0x6cd   : > { %v1924_v27 = vmul.f32 %v1923_v26, %v1923_v26 }
 0x6cf   : > { %v1925_v28 = vsel %vm431_vm1, %v1924_v27, 0.0 }
 0x6d0   : > { %1926 = vadd.xlane.f32.xlu1 %v1925_v28 }
 0x75d   : > { %v1927_v31 = vpop.xlane.xlu1 %1926 }
 0x75e   : > { %v1928_v32 = vmul.f32 0.03125, %v1927_v31 }
 0x760   : > { %v1929_v33 = vadd.f32 1e-05, %v1928_v32 }
 0x762   : > { %2832 = vrsqrt.f32 %v1929_v33 }
 0x76c   : > { %v2833_v37 = vpop.eup %2832 }
 0x76d   : > { %v1931_v38 = vmul.f32 %v2833_v37, %v1923_v26 }
 0x76f   : > { %v1936_v40 = vmul.f32 %v1935_v36, %v1931_v38 }
 0x771   : > { %v1941_v41 = vadd.f32 %v1940_v39, %v1936_v40 }
 0x773   : > { %v1942_v42 = vpack.c.bf16 %v1941_v41, %v1941_v41 }
 0x775   : > { %2675 = vmatmul.mubr.msk.bf16.vlgmr.msra.gmra.mrb[52].mxu0 %vm431_vm1, %v1942_v42 }
 0x848   : > { %v2003_v51 = vpop.f32.mrb[52].mxu0 }
 0x849   : > { %v2004_v52 = vadd.f32 %v2396_v50, %v2003_v51  ;;  %v2676_v53 = vpop.f32.mrb[53].mxu0 }
 0x84a   : > { %v2006_v54 = vpop.f32.mrb[54].mxu0 }
 0x84b   : > { %v2010_v55 = vmul.f32 0.044715, %v2004_v52  ;;  %v2677_v56 = vpop.f32.mrb[55].mxu0  ;;  %v2009_v62 = vmul.f32 0.5, %v2004_v52 }
 0x84d   : > { %v2011_v57 = vmul.f32 %v2010_v55, %v2004_v52 }
 0x84f   : > { %v2012_v58 = vmul.f32 %v2011_v57, %v2004_v52 }
 0x851   : > { %v2013_v59 = vadd.f32 %v2012_v58, %v2004_v52 }
 0x853   : > { %v2014_v60 = vmul.f32 0.7978846, %v2013_v59 }
 0x855   : > { %2834 = vtanh.f32 %v2014_v60 }
 0x85f   : > { %v2835_v61 = vpop.eup %2834 }
 0x860   : > { %v2016_v10 = vadd.f32 1.0, %v2835_v61 }
 0x862   : > { %v2017_v63 = vmul.f32 %v2016_v10, %v2009_v62 }
 0x864   : > { %v2018_v0 = vpack.c.bf16 %v2017_v63, %v2017_v63 }
 0x866   : > { %2695 = vmatmul.mubr.bf16.vlgmr.msra.gmra.mrb[44].mxu1 %v2018_v0 }
 0x938   : > { %2133 = sbr.rel (%p2408_p1) target bundleno = 2680 (0xa78), region = 60 }
 0x939   : > { %v2117_v5 = vpop.f32.mrb[44].mxu1 }
 0x93a   : > { %v2123_v6 = vadd.f32 %v2117_v5, %v3329_v23  ;;  %v2696_v7 = vpop.f32.mrb[45].mxu1 }
 0x93b   : > { %v2120_v8 = vpop.f32.mrb[46].mxu1 }
 0x93c   : > { %v2128_v9 = vadd.f32 %v2127_v4, %v2123_v6  ;;  %v2697_v11 = vpop.f32.mrb[47].mxu1 }
 0x93e   : > { %2129 = vst.msk [vmem:[#allocation2] sm:$0xff] %vm431_vm1, %v2128_v9  ;;  %v2136_v12 = vsel (!%p2408_p1), %vm431_vm1, %v2128_v9, 0.0 }
 0x93f   : > { %2137 = vadd.xlane.f32.xlu0 %v2136_v12 }
 0x9cc   : > { %v2138_v13 = vpop.xlane.xlu0 %2137 }
 0x9cd   : > { %v2139_v17 = vmul.f32 0.03125, %v2138_v13 }
 0x9cf   : > { %v2140_v14 = vsub.f32 %v2128_v9, %v2139_v17 }
 0x9d1   : > { %v2141_v19 = vmul.f32 %v2140_v14, %v2140_v14 }
 0x9d3   : > { %v2142_v15 = vsel %vm431_vm1, %v2141_v19, 0.0 }
 0x9d4   : > { %2143 = vadd.xlane.f32.xlu0 %v2142_v15 }
 0xa61   : > { %v2144_v16 = vpop.xlane.xlu0 %2143 }
 0xa62   : > { %v2145_v18 = vmul.f32 0.03125, %v2144_v16 }
 0xa64   : > { %v2146_v20 = vadd.f32 1e-05, %v2145_v18 }
 0xa66   : > { %2836 = vrsqrt.f32 %v2146_v20 }
 0xa70   : > { %v2837_v21 = vpop.eup %2836 }
 0xa71   : > { %v2148_v23 = vmul.f32 %v2837_v21, %v2140_v14 }
 0xa73   : > { %v2153_v24 = vmul.f32 %v2409_v22, %v2148_v23 }
 0xa75   : > { %v2158_v25 = vadd.f32 %v2410_v2, %v2153_v24 }
 0xa77   : > { %2159 = vst.msk [vmem:[%s390_s11] sm:$0xff] %vm431_vm1, %v2158_v25 }
 0xa78 PF: > { %s2412_s15 = sshll.u32 %s2920_s9, 7  ;;  %s3473_s21 = sld [smem:[#allocation18_spill]] }
 0xa79   : > { %s2174_s19 = sshll.u32 %s390_s11, 4  ;;  %s3474_s24 = sand.u32 1, %s2908_s28   ;;  %s2175_s19 = int_to_ptr.vmem [resolvable:$true] %s2174_s19 }
 0xa7a   : > { %s2161_s26 = scalar_lea.sflag [#allocation4], %s3474_s24  ;;  %s2838_s13 = scalar_lea.vmem %s2175_s19, 128 }
 0xa7b   : > { %p2839_p2 = scmp.ne.s32.totalorder %s2175_s19, %s2838_s13  ;;  %s2936_s14 = smov [#allocation3]  }
 0xa7c   : > { %s2842_s16 = sshll.u32 %s2936_s14, 4  ;;  %s2843_s16 = int_to_ptr.vmem [resolvable:$false] %s2842_s16 }
 0xa7d   : > { %p2840_p4 = pnand %p2839_p2, %p3031_p3  ;;  %s2844_s22 = scalar_lea.vmem %s2843_s16, 256 }
 0xa7e   : > { %s3383_s25 = scalar_lea.hbm %s3473_s21, %s2412_s15  ;;  %p2845_p6 = scmp.lt.s32.totalorder %s2175_s19, %s2843_s16 }
 0xa7f   : > { %p2841_p5 = pneg %p2840_p4  ;;  %p2846_p7 = scmp.lt.s32.totalorder %s2844_s22, %s2838_s13 }
 0xa81   : > { %p2847_p8 = por %p2846_p7, %p2845_p6 }
 0xa83   : > { %p2848_p10 = pnand %p2847_p8, %p2841_p5 }
 0xa85   : > { %2851 = shalt.err (!%p2848_p10)
}
 0xa86   : > { %s2852_s9 = scalar_lea.hbm %s3383_s25, 128  ;;  %s2856_s29 = scalar_lea.hbm %s3473_s21, 256 }
 0xa87   : > { %p2853_p11 = scmp.ne.s32.totalorder %s3383_s25, %s2852_s9  ;;  %p2857_p0 = scmp.lt.u32.totalorder %s3383_s25, %s3473_s21 }
 0xa88   : > { %p2858_p1 = scmp.lt.u32.totalorder %s2856_s29, %s2852_s9  ;;  %p2860_p4 = scmp.lt.u32.totalorder %s2852_s9, %s3383_s25 }
 0xa89   : > { %p2854_p12 = pnand %p2853_p11, %p3031_p3 }
 0xa8a   : > { %p2859_p2 = por %p2858_p1, %p2857_p0 }
 0xa8b   : > { %p2855_p13 = pneg %p2854_p12 }
 0xa8c   : > { %p2861_p5 = por %p2860_p4, %p2859_p2 }
 0xa8e   : > { %p2862_p6 = pnand %p2861_p5, %p2855_p13 }
 0xa90   : > { %2865 = shalt.err (!%p2862_p6)
}
 0xa91   : > { %2699 = dma.vmem_to_hbm [thread:$0]  (%p3031_p3), %s2175_s19, 128, %s3383_s25, %s2161_s26  }
 0xa92 PF: > { %s3475_s1 = sld [smem:[#allocation10_spill]]  ;;  %s3476_s8 = sld [smem:[#allocation6_spill]] }
 0xa98   : > { %p2705_p7 = scmp.ge.s32.totalorder %s3475_s1, 2  ;;  %s2186_s30 = sand.u32 1, %s3476_s8  }
 0xa99   : > { %s2187_s10 = scalar_lea.sflag [#allocation4], %s2186_s30 }
 0xa9a   : > { %p2702_p8 = pnand %p2705_p7, %p3041_p9 }
 0xa9c   : > { %2899 = dma.done.wait (!%p2702_p8), %s2187_s10, 128  }
 0xa9d   : > { %2901 = vsyncadd (!%p2702_p8), %s2187_s10, 4294967168  ;;  %s21_s12 = sadd.s32 1, %s3475_s1   ;;  %s3478_s15 = sld [smem:[#allocation7_spill]] }
 0xa9e   : > { %p18_p10 = scmp.ge.s32.totalorder %s21_s12, 6   ;;  %s3479_s29 = sld [smem:[#allocation15_spill]] }
 0xa9f   : > { %s3480_s30 = sld [smem:[#allocation8_spill]]  ;;  %s3481_s9 = sld [smem:[#allocation9_spill]] }
 0xaa0   : > { %s3482_s10 = sld [smem:[#allocation11_spill]]  ;;  %s3483_s11 = sld [smem:[#allocation13_spill]] }
 0xaa1   : > { %s3484_s27 = smov %s2908_s28  ;;  %20 = sbr.rel (!%p18_p10) target bundleno = 9 (0x9), region = 113 }
 0xaa3   : > { %s3485_s28 = smov %s3478_s15 }
 0xaa8   :  { %2192 = vsyncpa [#allocation4], 1 }
 0xaa9   :  { %2194 = vsyncpa [#allocation4 + $0x1], 1 }

</bundles_post_ra>
